<compile_context>
chip_gen: v7x
topology: tpu7x:2x2x1
jax: 0.10.0
libtpu: 0.0.40
codegen_flags: <defaults>
</compile_context>

<pallas_src>
import functools
import math

import jax
import jax.numpy as jnp
from jax.experimental import pallas as pl
from jax.experimental.pallas import tpu as pltpu


def _disc_kernel(xt_ref,
                 w1_ref, b1_ref,
                 w2_ref, b2_ref,
                 w3_ref, b3_ref,
                 w4_ref, b4_ref,
                 o_ref):
    # xt_ref: (8, tb) f32 tile -- rows 0..2 = [label, noise0, noise1], rows 3..7 zero.
    xt = xt_ref[...]
    w1 = w1_ref[...]                       # (256, 8) f32, cols 3..7 zero

    # --- Linear(3, 256) + ReLU : K=3 -> VPU broadcast FMAs (keeps MXU free) ---
    h = w1[:, 0:1] * xt[0:1, :]
    h = h + w1[:, 1:2] * xt[1:2, :]
    h = h + w1[:, 2:3] * xt[2:3, :]
    h = jnp.maximum(h + b1_ref[...], 0.0)  # (256, tb) f32   (Dropout -> identity)
    h = h.astype(jnp.bfloat16)

    # --- Linear(256, 128) + ReLU : bf16 MXU matmul, f32 accumulation ----------
    h = jnp.dot(w2_ref[...], h, preferred_element_type=jnp.float32)
    h = jnp.maximum(h + b2_ref[...], 0.0)  # (128, tb) f32   (Dropout -> identity)
    h = h.astype(jnp.bfloat16)

    # --- Linear(128, 64) + ReLU : bf16 MXU matmul, f32 accumulation -----------
    h = jnp.dot(w3_ref[...], h, preferred_element_type=jnp.float32)
    h = jnp.maximum(h + b3_ref[...], 0.0)  # (64, tb) f32    (Dropout -> identity)

    # --- Linear(64, 1) + Sigmoid : VPU multiply + sublane (XLU) reduce --------
    z = jnp.sum(h * w4_ref[...], axis=0, keepdims=True) + b4_ref[...]  # (1, tb)
    # numerically stable sigmoid (one exp on the EUP)
    ez = jnp.exp(-jnp.abs(z))
    r = 1.0 / (1.0 + ez)
    p = jnp.where(z >= 0.0, r, ez * r)
    o_ref[...] = p.astype(o_ref.dtype)     # lane-dense (1, tb) unmasked store


def _pack_params(params):
    """torch-layout (W[out,in] f32, b[out] f32) -> kernel layout."""
    (W1, b1), (W2, b2), (W3, b3), (W4, b4) = params
    w1 = jnp.zeros((256, 8), jnp.float32).at[:, :3].set(W1)   # K padded 3 -> 8
    w2 = W2.astype(jnp.bfloat16)                              # (128, 256)
    w3 = W3.astype(jnp.bfloat16)                              # (64, 128)
    w4 = W4.reshape(64, 1).astype(jnp.float32)                # column for VPU+XLU
    return (w1, b1.reshape(256, 1),
            w2, b2.reshape(128, 1),
            w3, b3.reshape(64, 1),
            w4, b4.reshape(1, 1))


@functools.partial(jax.jit, static_argnames=("tb",))
def discriminator_forward(noise, labels, params, *, tb=256):
    """noise: (B, noise_dim), labels: (B, label_dim); noise_dim + label_dim == 3."""
    # torch.cat((labels, noise), -1)
    x = jnp.concatenate([labels, noise], axis=-1).astype(jnp.float32)  # (B, 3)
    B, F = x.shape
    assert F == 3
    assert tb % 128 == 0 and tb >= 128, "batch tile must be a multiple of 128 lanes"

    # Pad batch to a multiple of tb; batch goes on the LANE axis, features on
    # sublanes (padded 3 -> 8) so loads/stores are unmasked and lane-dense.
    # For v7x pick B / tb >= 2 so both TensorCores get grid work.
    G = pl.cdiv(B, tb)
    B_pad = G * tb
    xt = jnp.zeros((8, B_pad), jnp.float32).at[:3, :B].set(x.T)

    packed = _pack_params(params)
    full = lambda a: pl.BlockSpec(a.shape, lambda i: (0, 0))  # resident whole-array block

    out = pl.pallas_call(
        _disc_kernel,
        out_shape=jax.ShapeDtypeStruct((1, B_pad), jnp.float32),
        grid_spec=pltpu.PrefetchScalarGridSpec(
            num_scalar_prefetch=0,
            grid=(G,),
            in_specs=[pl.BlockSpec((8, tb), lambda i: (0, i))]   # input tile
                     + [full(a) for a in packed],                # weights/biases
            out_specs=pl.BlockSpec((1, tb), lambda i: (0, i)),   # lane-dense out
        ),
        compiler_params=pltpu.CompilerParams(
            dimension_semantics=("parallel",)),
    )(xt, *packed)

    return out[0, :B].reshape(B, 1)


def init_params(key):
    """nn.Linear default init (uniform +/- 1/sqrt(fan_in)); torch layout W=[out,in]."""
    dims = [(3, 256), (256, 128), (128, 64), (64, 1)]
    params = []
    for fan_in, fan_out in dims:
        key, kw, kb = jax.random.split(key, 3)
        bound = 1.0 / math.sqrt(fan_in)
        W = jax.random.uniform(kw, (fan_out, fan_in), jnp.float32, -bound, bound)
        b = jax.random.uniform(kb, (fan_out,), jnp.float32, -bound, bound)
        params.append((W, b))
    return params


if __name__ == "__main__":
    key = jax.random.PRNGKey(0)
    k_params, k_noise, k_labels = jax.random.split(key, 3)

    params = init_params(k_params)

    B = 500                                                    # not a multiple of tb
    noise = jax.random.normal(k_noise, (B, 2), jnp.float32)    # noise dim = 2
    labels = jax.random.normal(k_labels, (B, 1), jnp.float32)  # label dim = 1

    out = discriminator_forward(noise, labels, params, tb=256)
    out = jax.block_until_ready(out)
    assert out.shape == (B, 1)

    # Reference in plain JAX with the same bf16 casts on the two MXU layers.
    x = jnp.concatenate([labels, noise], axis=-1)
    (W1, B1), (W2, B2), (W3, B3), (W4, B4) = params
    h = jnp.maximum(x @ W1.T + B1, 0.0)
    h = jnp.maximum(
        jnp.dot(h.astype(jnp.bfloat16), W2.T.astype(jnp.bfloat16),
                preferred_element_type=jnp.float32) + B2, 0.0)
    h = jnp.maximum(
        jnp.dot(h.astype(jnp.bfloat16), W3.T.astype(jnp.bfloat16),
                preferred_element_type=jnp.float32) + B3, 0.0)
    ref = jax.nn.sigmoid(h @ W4.T + B4)

    assert jnp.allclose(out, ref, atol=2e-3), "mismatch vs reference"

    print("KERNEL_OK")
</pallas_src>

<mosaic_0001>
module attributes {stable_mosaic.version = 11 : i64} {
  func.func @_disc_kernel(%arg0: i32, %arg1: memref<8x256xf32, #tpu.memory_space<vmem>>, %arg2: memref<256x8xf32, #tpu.memory_space<vmem>>, %arg3: memref<256x1xf32, #tpu.memory_space<vmem>>, %arg4: memref<128x256xbf16, #tpu.memory_space<vmem>>, %arg5: memref<128x1xf32, #tpu.memory_space<vmem>>, %arg6: memref<64x128xbf16, #tpu.memory_space<vmem>>, %arg7: memref<64x1xf32, #tpu.memory_space<vmem>>, %arg8: memref<64x1xf32, #tpu.memory_space<vmem>>, %arg9: memref<1x1xf32, #tpu.memory_space<vmem>>, %arg10: memref<1x256xf32, #tpu.memory_space<vmem>>) attributes {dimension_semantics = [#tpu.dimension_semantics<parallel>], iteration_bounds = array<i64: 2>, scalar_prefetch = 0 : i64, scratch_operands = 0 : i64, tpu.core_type = #tpu.core_type<tc>, window_params = [{transform_indices = @transform_0, window_bounds = array<i64: 8, 256>}, {pipeline_mode = #tpu.pipeline_mode<synchronous>, transform_indices = @transform_1, window_bounds = array<i64: 256, 8>}, {pipeline_mode = #tpu.pipeline_mode<synchronous>, transform_indices = @transform_2, window_bounds = array<i64: 256, 1>}, {pipeline_mode = #tpu.pipeline_mode<synchronous>, transform_indices = @transform_3, window_bounds = array<i64: 128, 256>}, {pipeline_mode = #tpu.pipeline_mode<synchronous>, transform_indices = @transform_4, window_bounds = array<i64: 128, 1>}, {pipeline_mode = #tpu.pipeline_mode<synchronous>, transform_indices = @transform_5, window_bounds = array<i64: 64, 128>}, {pipeline_mode = #tpu.pipeline_mode<synchronous>, transform_indices = @transform_6, window_bounds = array<i64: 64, 1>}, {pipeline_mode = #tpu.pipeline_mode<synchronous>, transform_indices = @transform_7, window_bounds = array<i64: 64, 1>}, {pipeline_mode = #tpu.pipeline_mode<synchronous>, transform_indices = @transform_8, window_bounds = array<i64: 1, 1>}, {transform_indices = @transform_9, window_bounds = array<i64: 1, 256>}]} {
    %c0 = arith.constant 0 : index
    %c0_0 = arith.constant 0 : index
    %0 = vector.load %arg1[%c0, %c0_0] : memref<8x256xf32, #tpu.memory_space<vmem>>, vector<8x256xf32>
    %c0_1 = arith.constant 0 : index
    %c0_2 = arith.constant 0 : index
    %1 = vector.load %arg2[%c0_1, %c0_2] : memref<256x8xf32, #tpu.memory_space<vmem>>, vector<256x8xf32>
    %2 = vector.extract_strided_slice %1 {offsets = [0, 0], sizes = [256, 1], strides = [1, 1]} : vector<256x8xf32> to vector<256x1xf32>
    %3 = vector.extract_strided_slice %0 {offsets = [0, 0], sizes = [1, 256], strides = [1, 1]} : vector<8x256xf32> to vector<1x256xf32>
    %4 = vector.broadcast %2 : vector<256x1xf32> to vector<256x256xf32>
    %5 = vector.broadcast %3 : vector<1x256xf32> to vector<256x256xf32>
    %6 = arith.mulf %4, %5 : vector<256x256xf32>
    %7 = vector.extract_strided_slice %1 {offsets = [0, 1], sizes = [256, 1], strides = [1, 1]} : vector<256x8xf32> to vector<256x1xf32>
    %8 = vector.extract_strided_slice %0 {offsets = [1, 0], sizes = [1, 256], strides = [1, 1]} : vector<8x256xf32> to vector<1x256xf32>
    %9 = vector.broadcast %7 : vector<256x1xf32> to vector<256x256xf32>
    %10 = vector.broadcast %8 : vector<1x256xf32> to vector<256x256xf32>
    %11 = arith.mulf %9, %10 : vector<256x256xf32>
    %12 = arith.addf %6, %11 : vector<256x256xf32>
    %13 = vector.extract_strided_slice %1 {offsets = [0, 2], sizes = [256, 1], strides = [1, 1]} : vector<256x8xf32> to vector<256x1xf32>
    %14 = vector.extract_strided_slice %0 {offsets = [2, 0], sizes = [1, 256], strides = [1, 1]} : vector<8x256xf32> to vector<1x256xf32>
    %15 = vector.broadcast %13 : vector<256x1xf32> to vector<256x256xf32>
    %16 = vector.broadcast %14 : vector<1x256xf32> to vector<256x256xf32>
    %17 = arith.mulf %15, %16 : vector<256x256xf32>
    %18 = arith.addf %12, %17 : vector<256x256xf32>
    %c0_3 = arith.constant 0 : index
    %c0_4 = arith.constant 0 : index
    %19 = vector.load %arg3[%c0_3, %c0_4] : memref<256x1xf32, #tpu.memory_space<vmem>>, vector<256x1xf32>
    %20 = vector.broadcast %19 : vector<256x1xf32> to vector<256x256xf32>
    %21 = arith.addf %18, %20 : vector<256x256xf32>
    %cst = arith.constant 0.000000e+00 : f32
    %22 = vector.broadcast %cst : f32 to vector<256x256xf32>
    %23 = arith.maximumf %21, %22 : vector<256x256xf32>
    %24 = arith.truncf %23 : vector<256x256xf32> to vector<256x256xbf16>
    %c0_5 = arith.constant 0 : index
    %c0_6 = arith.constant 0 : index
    %25 = vector.load %arg4[%c0_5, %c0_6] : memref<128x256xbf16, #tpu.memory_space<vmem>>, vector<128x256xbf16>
    %cst_7 = arith.constant dense<0.000000e+00> : vector<128x256xf32>
    %26 = tpu.matmul %25, %24, %cst_7 {dimension_numbers = #tpu.dot_dimension_numbers<[1], [0], [0], [1], [0, 0, 1, 1], [], []>} : vector<128x256xbf16>, vector<256x256xbf16>, vector<128x256xf32> -> vector<128x256xf32>
    %c0_8 = arith.constant 0 : index
    %c0_9 = arith.constant 0 : index
    %27 = vector.load %arg5[%c0_8, %c0_9] : memref<128x1xf32, #tpu.memory_space<vmem>>, vector<128x1xf32>
    %28 = vector.broadcast %27 : vector<128x1xf32> to vector<128x256xf32>
    %29 = arith.addf %26, %28 : vector<128x256xf32>
    %cst_10 = arith.constant 0.000000e+00 : f32
    %30 = vector.broadcast %cst_10 : f32 to vector<128x256xf32>
    %31 = arith.maximumf %29, %30 : vector<128x256xf32>
    %32 = arith.truncf %31 : vector<128x256xf32> to vector<128x256xbf16>
    %c0_11 = arith.constant 0 : index
    %c0_12 = arith.constant 0 : index
    %33 = vector.load %arg6[%c0_11, %c0_12] : memref<64x128xbf16, #tpu.memory_space<vmem>>, vector<64x128xbf16>
    %cst_13 = arith.constant dense<0.000000e+00> : vector<64x256xf32>
    %34 = tpu.matmul %33, %32, %cst_13 {dimension_numbers = #tpu.dot_dimension_numbers<[1], [0], [0], [1], [0, 0, 1, 1], [], []>} : vector<64x128xbf16>, vector<128x256xbf16>, vector<64x256xf32> -> vector<64x256xf32>
    %c0_14 = arith.constant 0 : index
    %c0_15 = arith.constant 0 : index
    %35 = vector.load %arg7[%c0_14, %c0_15] : memref<64x1xf32, #tpu.memory_space<vmem>>, vector<64x1xf32>
    %36 = vector.broadcast %35 : vector<64x1xf32> to vector<64x256xf32>
    %37 = arith.addf %34, %36 : vector<64x256xf32>
    %cst_16 = arith.constant 0.000000e+00 : f32
    %38 = vector.broadcast %cst_16 : f32 to vector<64x256xf32>
    %39 = arith.maximumf %37, %38 : vector<64x256xf32>
    %c0_17 = arith.constant 0 : index
    %c0_18 = arith.constant 0 : index
    %40 = vector.load %arg8[%c0_17, %c0_18] : memref<64x1xf32, #tpu.memory_space<vmem>>, vector<64x1xf32>
    %41 = vector.broadcast %40 : vector<64x1xf32> to vector<64x256xf32>
    %42 = arith.mulf %39, %41 : vector<64x256xf32>
    %cst_19 = arith.constant dense<0.000000e+00> : vector<256xf32>
    %43 = vector.multi_reduction <add>, %42, %cst_19 [0] : vector<64x256xf32> to vector<256xf32>
    %44 = vector.shape_cast %43 : vector<256xf32> to vector<1x256xf32>
    %c0_20 = arith.constant 0 : index
    %c0_21 = arith.constant 0 : index
    %45 = vector.load %arg9[%c0_20, %c0_21] : memref<1x1xf32, #tpu.memory_space<vmem>>, vector<1x1xf32>
    %46 = vector.broadcast %45 : vector<1x1xf32> to vector<1x256xf32>
    %47 = arith.addf %44, %46 : vector<1x256xf32>
    %48 = math.absf %47 : vector<1x256xf32>
    %cst_22 = arith.constant 0.000000e+00 : f32
    %49 = vector.broadcast %cst_22 : f32 to vector<1x256xf32>
    %50 = arith.subf %49, %48 : vector<1x256xf32>
    %51 = math.exp %50 : vector<1x256xf32>
    %cst_23 = arith.constant 1.000000e+00 : f32
    %52 = vector.broadcast %cst_23 : f32 to vector<1x256xf32>
    %53 = arith.addf %52, %51 : vector<1x256xf32>
    %cst_24 = arith.constant 1.000000e+00 : f32
    %54 = vector.broadcast %cst_24 : f32 to vector<1x256xf32>
    %55 = arith.divf %54, %53 : vector<1x256xf32>
    %cst_25 = arith.constant 0.000000e+00 : f32
    %56 = vector.broadcast %cst_25 : f32 to vector<1x256xf32>
    %57 = arith.cmpf oge, %47, %56 : vector<1x256xf32>
    %58 = arith.mulf %51, %55 : vector<1x256xf32>
    %59 = arith.select %57, %55, %58 : vector<1x256xi1>, vector<1x256xf32>
    %c0_26 = arith.constant 0 : index
    %c0_27 = arith.constant 0 : index
    %60 = vector.load %arg10[%c0_26, %c0_27] : memref<1x256xf32, #tpu.memory_space<vmem>>, vector<1x256xf32>
    tpu.vector_store %arg10[%c0_26, %c0_27], %59 {strides = array<i32>} : memref<1x256xf32, #tpu.memory_space<vmem>>, vector<1x256xf32>,
    return
  }
  func.func @transform_0(%arg0: i32) -> (i32, i32) {
    %c0_i32 = arith.constant 0 : i32
    %c0_i32_0 = arith.constant 0 : i32
    return %c0_i32, %arg0 : i32, i32
  }
  func.func @transform_1(%arg0: i32) -> (i32, i32) {
    %c0_i32 = arith.constant 0 : i32
    %c0_i32_0 = arith.constant 0 : i32
    %c0_i32_1 = arith.constant 0 : i32
    return %c0_i32, %c0_i32_0 : i32, i32
  }
  func.func @transform_2(%arg0: i32) -> (i32, i32) {
    %c0_i32 = arith.constant 0 : i32
    %c0_i32_0 = arith.constant 0 : i32
    %c0_i32_1 = arith.constant 0 : i32
    return %c0_i32, %c0_i32_0 : i32, i32
  }
  func.func @transform_3(%arg0: i32) -> (i32, i32) {
    %c0_i32 = arith.constant 0 : i32
    %c0_i32_0 = arith.constant 0 : i32
    %c0_i32_1 = arith.constant 0 : i32
    return %c0_i32, %c0_i32_0 : i32, i32
  }
  func.func @transform_4(%arg0: i32) -> (i32, i32) {
    %c0_i32 = arith.constant 0 : i32
    %c0_i32_0 = arith.constant 0 : i32
    %c0_i32_1 = arith.constant 0 : i32
    return %c0_i32, %c0_i32_0 : i32, i32
  }
  func.func @transform_5(%arg0: i32) -> (i32, i32) {
    %c0_i32 = arith.constant 0 : i32
    %c0_i32_0 = arith.constant 0 : i32
    %c0_i32_1 = arith.constant 0 : i32
    return %c0_i32, %c0_i32_0 : i32, i32
  }
  func.func @transform_6(%arg0: i32) -> (i32, i32) {
    %c0_i32 = arith.constant 0 : i32
    %c0_i32_0 = arith.constant 0 : i32
    %c0_i32_1 = arith.constant 0 : i32
    return %c0_i32, %c0_i32_0 : i32, i32
  }
  func.func @transform_7(%arg0: i32) -> (i32, i32) {
    %c0_i32 = arith.constant 0 : i32
    %c0_i32_0 = arith.constant 0 : i32
    %c0_i32_1 = arith.constant 0 : i32
    return %c0_i32, %c0_i32_0 : i32, i32
  }
  func.func @transform_8(%arg0: i32) -> (i32, i32) {
    %c0_i32 = arith.constant 0 : i32
    %c0_i32_0 = arith.constant 0 : i32
    %c0_i32_1 = arith.constant 0 : i32
    return %c0_i32, %c0_i32_0 : i32, i32
  }
  func.func @transform_9(%arg0: i32) -> (i32, i32) {
    %c0_i32 = arith.constant 0 : i32
    %c0_i32_0 = arith.constant 0 : i32
    return %c0_i32, %arg0 : i32, i32
  }
}

</mosaic_0001>

<bundles_post_ra>
// kernel: discriminator_forward.1
= control target key start
LH: loop header
LB: loop body
LE: loop exit
PB: predicated region body
PF: predicated region fallthrough
CT: control target
= control target key end

     0   :  { %s2396_s11 = smov 0   ;;  %s3316_s0 = inlined_call_operand.vmem [shape: f32[8,512], index: 0, kind: input, shape index: {}]   ;;  %s3317_s1 = inlined_call_operand.vmem [shape: f32[256,8], index: 1, kind: input, shape index: {}]   ;;  %s3318_s2 = inlined_call_operand.vmem [shape: f32[256,1], index: 2, kind: input, shape index: {}]   ;;  %s3319_s3 = inlined_call_operand.vmem [shape: bf16[128,256], index: 3, kind: input, shape index: {}]   ;;  %s3320_s4 = inlined_call_operand.vmem [shape: f32[128,1], index: 4, kind: input, shape index: {}]   ;;  %s3321_s5 = inlined_call_operand.vmem [shape: bf16[64,128], index: 5, kind: input, shape index: {}]   ;;  %s3322_s6 = inlined_call_operand.vmem [shape: f32[64,1], index: 6, kind: input, shape index: {}]   ;;  %s3323_s7 = inlined_call_operand.vmem [shape: f32[64,1], index: 7, kind: input, shape index: {}]   ;;  %s3324_s8 = inlined_call_operand.<no memory space> [shape: f32[1,1], index: 8, kind: input, shape index: {}]   ;;  %s3325_s9 = inlined_call_operand.vmem [shape: f32[1,512], index: 9, kind: output, shape index: {}]  }
   0x1   :  { %v14_v0 = vstv %s3324_s8 }
   0x2   :  { %15 = vst [vmem:[#allocation2] sm:$0x1] %v14_v0 }
   0x3 LB: > { %s2200_s12 = sadd.s32 4294967295, %s2337_s11   ;;  %p2204_p0 = scmp.ge.s32.totalorder %s2337_s11, 1  ;;  %s2337_s11 = sphi %s2396_s11, %s21_s11  }
   0x4   : > { %p290_p1 = scmp.lt.s32.totalorder %s2337_s11, 3 }
   0x6   : > { %p291_p2 = pnand %p2204_p0, %p290_p1 }
   0x8   : > { %294 = sbr.rel (%p291_p2) target bundleno = 1100 (0x44c), region = 56 }
   0xf   : > { %v2407_v1 = vld [vmem:[%s3317_s1] sm:$0xff]  ;;  %v3329_v2 = vmov 2   ;;  %v3331_v3 = vmov 1   ;;  %v341_v4 = vld [vmem:[%s3317_s1 + $0x10] sm:$0xff]  ;;  %v2419_v5 = vld [vmem:[%s3317_s1 + $0x8] sm:$0xff]  ;;  %v3327_v6 = vmov 0  }
  0x10   : > { %2243 = vset.pattern.permute.xlu0 %v3329_v2  ;;  %2242 = vset.pattern.permute.xlu1 %v3331_v3  ;;  %v344_v7 = vld [vmem:[%s3317_s1 + $0x28] sm:$0xff]  ;;  %v343_v8 = vld [vmem:[%s3317_s1 + $0x20] sm:$0xff]  ;;  %v346_v9 = vld [vmem:[%s3317_s1 + $0x38] sm:$0xff]  ;;  %s2205_s18 = sshll.u32 %s2200_s12, 1 }
  0x11   : > { %868 = vperm.xlu0 %2243, %v2407_v1   ;;  %604 = vperm.xlu1 %2242, %v2407_v1   ;;  %v2439_v10 = vld [vmem:[%s3317_s1 + $0x48] sm:$0xff]  ;;  %v342_v11 = vld [vmem:[%s3317_s1 + $0x18] sm:$0xff]  ;;  %v1131_v15 = vld [vmem:[%s3318_s2] sm:$0xff]  ;;  %p326_p3 = scmp.lt.s32.totalorder %s2205_s18, 3 }
  0x12   : > { %1948 = vmatprep.mubr.bf16.mxu1 %v3327_v6  ;;  %v2449_v12 = vld [vmem:[%s3317_s1 + $0x58] sm:$0xff]  ;;  %v2455_v13 = vld [vmem:[%s3317_s1 + $0x68] sm:$0xff]  ;;  %v1133_v21 = vld [vmem:[%s3318_s2 + $0x10] sm:$0xff] }
  0x13   : > { %v2462_v14 = vld [vmem:[%s3317_s1 + $0x78] sm:$0xff]  ;;  %v2472_v16 = vld [vmem:[%s3317_s1 + $0x88] sm:$0xff]  ;;  %v345_v26 = vld [vmem:[%s3317_s1 + $0x30] sm:$0xff]  ;;  %s3371_s18 = smov (!%p326_p3, %s2205_s18), 3 }
  0x14   : > { %v2478_v17 = vld [vmem:[%s3317_s1 + $0x98] sm:$0xff]  ;;  %v2484_v18 = vld [vmem:[%s3317_s1 + $0xa8] sm:$0xff]  ;;  %v347_v29 = vld [vmem:[%s3317_s1 + $0x40] sm:$0xff]  ;;  %s2206_s24 = sshll.u32 %s3371_s18, 3  ;;  %s334_s8 = scalar_lea.vmem %s3325_s9, %s3371_s18 }
  0x15   : > { %876 = vperm.xlu0 %2243, %v341_v4   ;;  %608 = vperm.xlu1 %2242, %v2419_v5   ;;  %v2491_v19 = vld [vmem:[%s3317_s1 + $0xb8] sm:$0xff]  ;;  %v2498_v20 = vld [vmem:[%s3317_s1 + $0xc8] sm:$0xff]  ;;  %v1135_v30 = vld [vmem:[%s3318_s2 + $0x20] sm:$0xff]  ;;  %s329_s29 = scalar_lea.vmem %s3316_s0, %s2206_s24 }
  0x16   : > { %v2507_v22 = vld [vmem:[%s3317_s1 + $0xd8] sm:$0xff]  ;;  %v2517_v24 = vld [vmem:[%s3317_s1 + $0xe8] sm:$0xff]  ;;  %v1137_v31 = vld [vmem:[%s3318_s2 + $0x30] sm:$0xff] }
  0x17   : > { %v1134_v23 = vld [vmem:[%s3318_s2 + $0x18] sm:$0xff]  ;;  %v1132_v27 = vld [vmem:[%s3318_s2 + $0x8] sm:$0xff]  ;;  %v1139_v32 = vld [vmem:[%s3318_s2 + $0x40] sm:$0xff] }
  0x18   : > { %v2523_v25 = vld [vmem:[%s3317_s1 + $0xf8] sm:$0xff]  ;;  %v1136_v28 = vld [vmem:[%s3318_s2 + $0x28] sm:$0xff]  ;;  %v349_v34 = vld [vmem:[%s3317_s1 + $0x50] sm:$0xff] }
  0x19   : > { %888 = vperm.xlu0 %2243, %v344_v7   ;;  %2244 = vset.pattern.permute.xlu1 %v3329_v2  ;;  %v1138_v33 = vld [vmem:[%s3318_s2 + $0x38] sm:$0xff]  ;;  %v1141_v35 = vld [vmem:[%s3318_s2 + $0x50] sm:$0xff]  ;;  %v1143_v36 = vld [vmem:[%s3318_s2 + $0x60] sm:$0xff] }
  0x1a   : > { %872 = vperm.xlu1 %2244, %v2419_v5   ;;  %v1140_v37 = vld [vmem:[%s3318_s2 + $0x48] sm:$0xff]  ;;  %v1145_v40 = vld [vmem:[%s3318_s2 + $0x70] sm:$0xff]  ;;  %v351_v41 = vld [vmem:[%s3317_s1 + $0x60] sm:$0xff] }
  0x1b   : > { %v1147_v45 = vld [vmem:[%s3318_s2 + $0x80] sm:$0xff]  ;;  %v1149_v49 = vld [vmem:[%s3318_s2 + $0x90] sm:$0xff]  ;;  %v1142_v53 = vld [vmem:[%s3318_s2 + $0x58] sm:$0xff] }
  0x1c   : > { %v1151_v55 = vld [vmem:[%s3318_s2 + $0xa0] sm:$0xff]  ;;  %v353_v57 = vld [vmem:[%s3317_s1 + $0x70] sm:$0xff] }
  0x1d   : > { %2251 = vset.pattern.permute.xlu0 %v3331_v3  ;;  %v1153_v60 = vld [vmem:[%s3318_s2 + $0xb0] sm:$0xff] }
  0x1e   : > { %620 = vperm.xlu0 %2251, %v343_v8   ;;  %2245 = vset.pattern.permute.xlu1 %v3327_v6 }
  0x1f   : > { %383 = vperm.xlu1 %2245, %v341_v4  }
  0x22   : > { %632 = vperm.xlu0 %2251, %v346_v9  }
  0x23   : > { %2246 = vset.pattern.permute.xlu1 %v3331_v3 }
  0x24   : > { %612 = vperm.xlu1 %2246, %v341_v4  }
  0x26   : > { %640 = vperm.xlu0 %2251, %v2439_v10  }
  0x28   : > { %616 = vperm.xlu1 %2246, %v342_v11  }
  0x2a   : > { %648 = vperm.xlu0 %2251, %v2449_v12  }
  0x2c   : > { %2247 = vset.pattern.permute.xlu1 %v3329_v2 }
  0x2d   : > { %880 = vperm.xlu1 %2247, %v342_v11  }
  0x2e   : > { %656 = vperm.xlu0 %2251, %v2455_v13  }
  0x31   : > { %2248 = vset.pattern.permute.xlu1 %v3327_v6 }
  0x32   : > { %664 = vperm.xlu0 %2251, %v2462_v14   ;;  %1165 = vperm.xlu1 %2248, %v1131_v15  }
  0x36   : > { %672 = vperm.xlu0 %2251, %v2472_v16   ;;  %393 = vperm.xlu1 %2248, %v343_v8  }
  0x3a   : > { %680 = vperm.xlu0 %2251, %v2478_v17   ;;  %398 = vperm.xlu1 %2248, %v344_v7  }
  0x3e   : > { %688 = vperm.xlu0 %2251, %v2484_v18   ;;  %2249 = vset.pattern.permute.xlu1 %v3331_v3 }
  0x3f   : > { %624 = vperm.xlu1 %2249, %v344_v7  }
  0x42   : > { %696 = vperm.xlu0 %2251, %v2491_v19  }
  0x43   : > { %2250 = vset.pattern.permute.xlu1 %v3329_v2 }
  0x44   : > { %884 = vperm.xlu1 %2250, %v343_v8   ;;  %v1144_v8 = vld [vmem:[%s3318_s2 + $0x68] sm:$0xff] }
  0x46   : > { %704 = vperm.xlu0 %2251, %v2498_v20  }
  0x48   : > { %2252 = vset.pattern.permute.xlu1 %v3327_v6 }
  0x49   : > { %1175 = vperm.xlu1 %2252, %v1133_v21  }
  0x4a   : > { %712 = vperm.xlu0 %2251, %v2507_v22  }
  0x4d   : > { %1180 = vperm.xlu1 %2252, %v1134_v23   ;;  %v1159_v23 = vld [vmem:[%s3318_s2 + $0xe0] sm:$0xff] }
  0x4e   : > { %720 = vperm.xlu0 %2251, %v2517_v24  }
  0x51   : > { %408 = vperm.xlu1 %2252, %v346_v9  }
  0x52   : > { %728 = vperm.xlu0 %2251, %v2523_v25  }
  0x55   : > { %2253 = vset.pattern.permute.xlu1 %v3331_v3 }
  0x56   : > { %2290 = vset.pattern.permute.xlu0 %v3327_v6  ;;  %628 = vperm.xlu1 %2253, %v345_v26  }
  0x57   : > { %373 = vperm.xlu0 %2290, %v2407_v1   ;;  %v1155_v1 = vld [vmem:[%s3318_s2 + $0xc0] sm:$0xff] }
  0x5a   : > { %2254 = vset.pattern.permute.xlu1 %v3329_v2 }
  0x5b   : > { %378 = vperm.xlu0 %2290, %v2419_v5   ;;  %892 = vperm.xlu1 %2254, %v345_v26  }
  0x5f   : > { %388 = vperm.xlu0 %2290, %v342_v11   ;;  %896 = vperm.xlu1 %2254, %v346_v9  }
  0x63   : > { %1170 = vperm.xlu0 %2290, %v1132_v27   ;;  %2255 = vset.pattern.permute.xlu1 %v3327_v6  ;;  %v1162_v27 = vld [vmem:[%s3318_s2 + $0xf8] sm:$0xff] }
  0x64   : > { %1190 = vperm.xlu1 %2255, %v1136_v28  }
  0x67   : > { %403 = vperm.xlu0 %2290, %v345_v26  }
  0x68   : > { %413 = vperm.xlu1 %2255, %v347_v29  }
  0x6b   : > { %1185 = vperm.xlu0 %2290, %v1135_v30   ;;  %v337_v30 = vld [vmem:[%s329_s29] sm:$0xff] }
  0x6c   : > { %2256 = vset.pattern.permute.xlu1 %v3331_v3 }
  0x6d   : > { %636 = vperm.xlu1 %2256, %v347_v29  }
  0x6f   : > { %418 = vperm.xlu0 %2290, %v2439_v10  }
  0x71   : > { %2257 = vset.pattern.permute.xlu1 %v3329_v2 }
  0x72   : > { %900 = vperm.xlu1 %2257, %v347_v29  }
  0x73   : > { %1195 = vperm.xlu0 %2290, %v1137_v31   ;;  %v338_v31 = vld [vmem:[%s329_s29 + $0x8] sm:$0xff] }
  0x76   : > { %904 = vperm.xlu1 %2257, %v2439_v10   ;;  %v1157_v10 = vld [vmem:[%s3318_s2 + $0xd0] sm:$0xff] }
  0x77   : > { %428 = vperm.xlu0 %2290, %v2449_v12  }
  0x7a   : > { %2258 = vset.pattern.permute.xlu1 %v3327_v6 }
  0x7b   : > { %1205 = vperm.xlu0 %2290, %v1139_v32   ;;  %1200 = vperm.xlu1 %2258, %v1138_v33  }
  0x7f   : > { %438 = vperm.xlu0 %2290, %v2455_v13   ;;  %423 = vperm.xlu1 %2258, %v349_v34  }
  0x83   : > { %1215 = vperm.xlu0 %2290, %v1141_v35   ;;  %2259 = vset.pattern.permute.xlu1 %v3331_v3  ;;  %v1500_v35 = vld [vmem:[%s3320_s4 + $0x8] sm:$0xff] }
  0x84   : > { %644 = vperm.xlu1 %2259, %v349_v34  }
  0x87   : > { %448 = vperm.xlu0 %2290, %v2462_v14  }
  0x88   : > { %2260 = vset.pattern.permute.xlu1 %v3329_v2 }
  0x89   : > { %908 = vperm.xlu1 %2260, %v349_v34  }
  0x8b   : > { %1225 = vperm.xlu0 %2290, %v1143_v36  }
  0x8d   : > { %912 = vperm.xlu1 %2260, %v2449_v12   ;;  %v355_v12 = vld [vmem:[%s3317_s1 + $0x80] sm:$0xff] }
  0x8f   : > { %458 = vperm.xlu0 %2290, %v2472_v16  }
  0x90   : > { %v2580_v38 = vpop.permute.xlu1 %604  ;;  %v2582_v39 = vpop.permute.xlu0 %868 }
  0x91   : > { %2261 = vset.pattern.permute.xlu1 %v3327_v6 }
  0x92   : > { %1210 = vperm.xlu1 %2261, %v1140_v37  }
  0x93   : > { %1235 = vperm.xlu0 %2290, %v1145_v40  }
  0x94   : > { %v2591_v42 = vpop.permute.xlu1 %608  ;;  %v2593_v43 = vpop.permute.xlu0 %876 }
  0x96   : > { %433 = vperm.xlu1 %2261, %v351_v41  }
  0x97   : > { %468 = vperm.xlu0 %2290, %v2478_v17  }
  0x98   : > { %v2596_v44 = vpop.permute.xlu0 %888 }
  0x99   : > { %v2601_v46 = vpop.permute.xlu1 %872 }
  0x9a   : > { %2262 = vset.pattern.permute.xlu1 %v3331_v3 }
  0x9b   : > { %1245 = vperm.xlu0 %2290, %v1147_v45   ;;  %652 = vperm.xlu1 %2262, %v351_v41  }
  0x9d   : > { %v2604_v47 = vpop.permute.xlu0 %620 }
  0x9e   : > { %v2606_v48 = vpop.permute.xlu1 %383 }
  0x9f   : > { %478 = vperm.xlu0 %2290, %v2484_v18   ;;  %2263 = vset.pattern.permute.xlu1 %v3329_v2 }
  0xa0   : > { %916 = vperm.xlu1 %2263, %v351_v41  }
  0xa1   : > { %v2613_v50 = vpop.permute.xlu0 %632 }
  0xa3   : > { %1255 = vperm.xlu0 %2290, %v1149_v49   ;;  %v2615_v51 = vpop.permute.xlu1 %612 }
  0xa4   : > { %920 = vperm.xlu1 %2263, %v2455_v13  }
  0xa5   : > { %v2618_v52 = vpop.permute.xlu0 %640 }
  0xa7   : > { %488 = vperm.xlu0 %2290, %v2491_v19   ;;  %v2624_v54 = vpop.permute.xlu1 %616 }
  0xa8   : > { %2264 = vset.pattern.permute.xlu1 %v3327_v6 }
  0xa9   : > { %1220 = vperm.xlu1 %2264, %v1142_v53   ;;  %v2630_v56 = vpop.permute.xlu0 %648 }
  0xab   : > { %1265 = vperm.xlu0 %2290, %v1151_v55   ;;  %v1502_v55 = vld [vmem:[%s3320_s4 + $0x18] sm:$0xff] }
  0xac   : > { %v2635_v58 = vpop.permute.xlu1 %880 }
  0xad   : > { %443 = vperm.xlu1 %2264, %v353_v57   ;;  %v2637_v59 = vpop.permute.xlu0 %656 }
  0xaf   : > { %498 = vperm.xlu0 %2290, %v2498_v20  }
  0xb1   : > { %2265 = vset.pattern.permute.xlu1 %v3331_v3  ;;  %v2644_v61 = vpop.permute.xlu1 %1165  ;;  %v2646_v62 = vpop.permute.xlu0 %664 }
  0xb2   : > { %3344 = vst [vmem:[#allocation3_spill] sm:$0xff] %v2646_v62  ;;  %660 = vperm.xlu1 %2265, %v353_v57  }
  0xb3   : > { %1275 = vperm.xlu0 %2290, %v1153_v60  }
  0xb5   : > { %v2648_v63 = vpop.permute.xlu1 %393  ;;  %v2650_v0 = vpop.permute.xlu0 %672 }
  0xb6   : > { %3345 = vst [vmem:[#allocation4_spill] sm:$0xff] %v2650_v0  ;;  %2266 = vset.pattern.permute.xlu1 %v3329_v2 }
  0xb7   : > { %508 = vperm.xlu0 %2290, %v2507_v22   ;;  %924 = vperm.xlu1 %2266, %v353_v57   ;;  %v1146_v57 = vld [vmem:[%s3318_s2 + $0x78] sm:$0xff] }
  0xb9   : > { %v2657_v4 = vpop.permute.xlu1 %398  ;;  %v2659_v5 = vpop.permute.xlu0 %680 }
  0xba   : > { %3346 = vst [vmem:[#allocation5_spill] sm:$0xff] %v2659_v5 }
  0xbb   : > { %1285 = vperm.xlu0 %2290, %v1155_v1   ;;  %928 = vperm.xlu1 %2266, %v2462_v14   ;;  %v3326_v14 = vlaneseq }
  0xbd   : > { %v2664_v7 = vpop.permute.xlu0 %688 }
  0xbe   : > { %3347 = vst [vmem:[#allocation6_spill] sm:$0xff] %v2664_v7  ;;  %v2669_v9 = vpop.permute.xlu1 %624 }
  0xbf   : > { %518 = vperm.xlu0 %2290, %v2517_v24   ;;  %2267 = vset.pattern.permute.xlu1 %v3327_v6  ;;  %v2696_v24 = vshrl.u32 %v3326_v14, 7 }
  0xc0   : > { %1230 = vperm.xlu1 %2267, %v1144_v8  }
  0xc1   : > { %v2676_v11 = vpop.permute.xlu0 %696  ;;  %3350 = vst [vmem:[#allocation9_spill] sm:$0xff] %v2696_v24  ;;  %v733_v28 = vsub.s32 1, %v2696_v24  ;;  %v2713_v32 = vsub.s32 0, %v2696_v24  ;;  %v997_v33 = vsub.s32 2, %v2696_v24 }
  0xc2   : > { %3348 = vst [vmem:[#allocation7_spill] sm:$0xff] %v2676_v11 }
  0xc3   : > { %1295 = vperm.xlu0 %2290, %v1157_v10   ;;  %v2681_v13 = vpop.permute.xlu1 %884  ;;  %3353 = vst [vmem:[#allocation12_spill] sm:$0xff] %v2713_v32  ;;  %v2721_v36 = vrot.slane %v337_v30, %v733_v28  ;;  %v2725_v40 = vrot.slane %v338_v31, %v733_v28  ;;  %v2729_v41 = vrot.slane %v337_v30, %v2713_v32 }
  0xc4   : > { %453 = vperm.xlu1 %2267, %v355_v12   ;;  %v2731_v45 = vrot.slane %v337_v30, %v997_v33  ;;  %v2733_v49 = vrot.slane %v338_v31, %v997_v33  ;;  %v2736_v53 = vrot.slane %v338_v31, %v2713_v32 }
  0xc5   : > { %v2685_v15 = vpop.permute.xlu0 %704  ;;  %v743_v60 = vmul.f32 %v2721_v36, %v2615_v51  ;;  %v740_v8 = vmul.f32 %v2725_v40, %v2580_v38  ;;  %v543_v28 = vmul.f32 %v2729_v41, %v2606_v48  ;;  %v746_v24 = vmul.f32 %v2725_v40, %v2624_v54 }
  0xc6   : > { %3349 = vst [vmem:[#allocation8_spill] sm:$0xff] %v2685_v15  ;;  %v1003_v10 = vmul.f32 %v2731_v45, %v2582_v39  ;;  %v544_v33 = vmul.f32 %v2736_v53, %v2606_v48  ;;  %v2785_v48 = vmul.f32 %v2731_v45, %v2596_v44  ;;  %v1011_v11 = vmul.f32 %v2731_v45, %v2681_v13 }
  0xc7   : > { %528 = vperm.xlu0 %2290, %v2523_v25  }
  0xc8   : > { %2268 = vset.pattern.permute.xlu1 %v3331_v3  ;;  %v2690_v21 = vpop.permute.xlu1 %1175  ;;  %v748_v3 = vmul.f32 %v2725_v40, %v2604_v47 }
  0xc9   : > { %668 = vperm.xlu1 %2268, %v355_v12   ;;  %v2698_v26 = vpop.permute.xlu0 %712 }
  0xca   : > { %3351 = vst [vmem:[#allocation10_spill] sm:$0xff] %v2698_v26 }
  0xcb   : > { %1305 = vperm.xlu0 %2290, %v1159_v23   ;;  %v744_v23 = vmul.f32 %v2725_v40, %v2615_v51  ;;  %v1007_v51 = vmul.f32 %v2731_v45, %v2593_v43 }
  0xcc   : > { %v2703_v25 = vpop.permute.xlu1 %1180 }
  0xcd   : > { %2269 = vset.pattern.permute.xlu1 %v3329_v2  ;;  %v2710_v29 = vpop.permute.xlu0 %720  ;;  %v2789_v2 = vmul.f32 %v2733_v49, %v2596_v44  ;;  %v745_v44 = vmul.f32 %v2721_v36, %v2624_v54  ;;  %v547_v54 = vmul.f32 %v2729_v41, %v2648_v63 }
  0xce   : > { %3352 = vst [vmem:[#allocation11_spill] sm:$0xff] %v2710_v29  ;;  %932 = vperm.xlu1 %2269, %v355_v12   ;;  %v1004_v12 = vmul.f32 %v2733_v49, %v2582_v39  ;;  %v742_v39 = vmul.f32 %v2725_v40, %v2591_v42 }
  0xcf   : > { %1320 = vperm.xlu0 %2290, %v1162_v27  }
  0xd0   : > { %v2716_v34 = vpop.permute.xlu1 %408 }
  0xd1   : > { %v2723_v37 = vpop.permute.xlu0 %728 }
  0xd2   : > { %3354 = vst [vmem:[#allocation13_spill] sm:$0xff] %v2723_v37  ;;  %936 = vperm.xlu1 %2269, %v2472_v16   ;;  %v739_v16 = vmul.f32 %v2721_v36, %v2580_v38  ;;  %v741_v38 = vmul.f32 %v2721_v36, %v2591_v42  ;;  %v2779_v42 = vld [vmem:[%s3317_s1 + $0x90] sm:$0xff]  ;;  %v749_v37 = vmul.f32 %v2721_v36, %v2669_v9 }
  0xd3   : > { %1522 = vperm.xlu0 %2290, %v1500_v35   ;;  %v1504_v35 = vld [vmem:[%s3320_s4 + $0x28] sm:$0xff] }
  0xd5   : > { %v2748_v1 = vpop.permute.xlu1 %628 }
  0xd6   : > { %v374_v27 = vpop.permute.xlu0 %373  ;;  %2270 = vset.pattern.permute.xlu1 %v3327_v6  ;;  %v1005_v6 = vmul.f32 %v2731_v45, %v2601_v46 }
  0xd7   : > { %v539_v30 = vmul.f32 %v2729_v41, %v374_v27  ;;  %v540_v31 = vmul.f32 %v2736_v53, %v374_v27  ;;  %1532 = vperm.xlu0 %2290, %v1502_v55   ;;  %1240 = vperm.xlu1 %2270, %v1146_v57   ;;  %v1008_v55 = vmul.f32 %v2733_v49, %v2593_v43 }
  0xd8   : > { %v807_v57 = vadd.f32 %v743_v60, %v543_v28  ;;  %v808_v43 = vadd.f32 %v744_v23, %v544_v33  ;;  %v747_v28 = vmul.f32 %v2721_v36, %v2604_v47  ;;  %v1009_v47 = vmul.f32 %v2731_v45, %v2635_v58 }
  0xd9   : > { %v803_v27 = vadd.f32 %v739_v16, %v539_v30  ;;  %v804_v14 = vadd.f32 %v740_v8, %v540_v31  ;;  %v1006_v8 = vmul.f32 %v2733_v49, %v2601_v46  ;;  %v1506_v46 = vld [vmem:[%s3320_s4 + $0x38] sm:$0xff] }
  0xda   : > { %v379_v60 = vpop.permute.xlu0 %378  ;;  %v2791_v16 = vpop.permute.xlu1 %892  ;;  %v1071_v32 = vadd.f32 %v1007_v51, %v807_v57  ;;  %v3355_v51 = vmov 1  }
  0xdb   : > { %v541_v30 = vmul.f32 %v2729_v41, %v379_v60  ;;  %v542_v31 = vmul.f32 %v2736_v53, %v379_v60  ;;  %1542 = vperm.xlu0 %2290, %v1504_v35   ;;  %v1067_v23 = vadd.f32 %v1003_v10, %v803_v27  ;;  %463 = vperm.xlu1 %2270, %v2779_v42  }
  0xdc   : > { %v1068_v33 = vadd.f32 %v1004_v12, %v804_v14  ;;  %v750_v10 = vmul.f32 %v2725_v40, %v2669_v9  ;;  %v1072_v27 = vadd.f32 %v1008_v55, %v808_v43  ;;  %v1010_v14 = vmul.f32 %v2733_v49, %v2635_v58  ;;  %v1508_v58 = vld [vmem:[%s3320_s4 + $0x48] sm:$0xff] }
  0xdd   : > { %v805_v60 = vadd.f32 %v741_v38, %v541_v30  ;;  %v806_v35 = vadd.f32 %v742_v39, %v542_v31  ;;  %v549_v39 = vmul.f32 %v2729_v41, %v2657_v4  ;;  %v550_v9 = vmul.f32 %v2736_v53, %v2657_v4 }
  0xde   : > { %v389_v29 = vpop.permute.xlu0 %388  ;;  %v2815_v26 = vpop.permute.xlu1 %896  ;;  %v1324_v55 = vadd.f32 %v2644_v61, %v1068_v33  ;;  %v1323_v57 = vadd.f32 %v2644_v61, %v1067_v23  ;;  %v3356_v23 = vmov 2  }
  0xdf   : > { %v545_v12 = vmul.f32 %v2729_v41, %v389_v29  ;;  %v546_v38 = vmul.f32 %v2736_v53, %v389_v29  ;;  %1552 = vperm.xlu0 %2290, %v1506_v46   ;;  %2271 = vset.pattern.permute.xlu1 %v3355_v51  ;;  %v1069_v29 = vadd.f32 %v1005_v6, %v805_v60 }
  0xe0   : > { %676 = vperm.xlu1 %2271, %v2779_v42   ;;  %v1070_v31 = vadd.f32 %v1006_v8, %v806_v35  ;;  %v548_v46 = vmul.f32 %v2736_v53, %v2648_v63  ;;  %v813_v4 = vadd.f32 %v749_v37, %v549_v39  ;;  %v814_v15 = vadd.f32 %v750_v10, %v550_v9  ;;  %v1510_v63 = vld [vmem:[%s3320_s4 + $0x58] sm:$0xff] }
  0xe1   : > { %v809_v43 = vadd.f32 %v745_v44, %v545_v12  ;;  %v810_v30 = vadd.f32 %v746_v24, %v546_v38  ;;  %v1012_v24 = vmul.f32 %v2733_v49, %v2681_v13  ;;  %v1328_v6 = vadd.f32 %v2690_v21, %v1072_v27 }
  0xe2   : > { %v1171_v7 = vpop.permute.xlu0 %1170  ;;  %v1388_v37 = vmax.f32 %v1324_v55, 0.0  ;;  %v1387_v8 = vmax.f32 %v1323_v57, 0.0  ;;  %v1327_v10 = vadd.f32 %v2690_v21, %v1071_v32  ;;  %v812_v27 = vadd.f32 %v748_v3, %v548_v46 }
  0xe3   : > { %v1073_v5 = vadd.f32 %v1009_v47, %v809_v43  ;;  %v1074_v0 = vadd.f32 %v1010_v14, %v810_v30  ;;  %v1325_v33 = vadd.f32 %v1171_v7, %v1069_v29  ;;  %v1326_v62 = vadd.f32 %v1171_v7, %v1070_v31  ;;  %1562 = vperm.xlu0 %2290, %v1508_v58   ;;  %v1191_v61 = vpop.permute.xlu1 %1190 }
  0xe4   : > { %2272 = vset.pattern.permute.xlu1 %v3356_v23  ;;  %v811_v47 = vadd.f32 %v747_v28, %v547_v54  ;;  %v1077_v14 = vadd.f32 %v2785_v48, %v813_v4  ;;  %v1392_v9 = vmax.f32 %v1328_v6, 0.0  ;;  %v1076_v32 = vadd.f32 %v1012_v24, %v812_v27 }
  0xe5   : > { %v1389_v44 = vmax.f32 %v1325_v33, 0.0  ;;  %v1390_v60 = vmax.f32 %v1326_v62, 0.0  ;;  %v1330_v35 = vadd.f32 %v2703_v25, %v1074_v0  ;;  %v1329_v7 = vadd.f32 %v2703_v25, %v1073_v5  ;;  %940 = vperm.xlu1 %2272, %v2779_v42   ;;  %v1512_v0 = vld [vmem:[%s3320_s4 + $0x68] sm:$0xff] }
  0xe6   : > { %v404_v13 = vpop.permute.xlu0 %403  ;;  %v1078_v62 = vadd.f32 %v2789_v2, %v814_v15  ;;  %v1075_v25 = vadd.f32 %v1011_v11, %v811_v47  ;;  %v1391_v3 = vmax.f32 %v1327_v10, 0.0  ;;  %v1333_v42 = vadd.f32 %v1191_v61, %v1077_v14  ;;  %v1148_v15 = vld [vmem:[%s3318_s2 + $0x88] sm:$0xff] }
  0xe7   : > { %1572 = vperm.xlu0 %2290, %v1510_v63   ;;  %v2850_v12 = vpop.permute.xlu1 %413  ;;  %v1452_v38 = vpack.c.bf16 %v1390_v60, %v1388_v37  ;;  %v1451_v39 = vpack.c.bf16 %v1389_v44, %v1387_v8  ;;  %v1394_v5 = vmax.f32 %v1330_v35, 0.0  ;;  %v1393_v21 = vmax.f32 %v1329_v7, 0.0  ;;  %v1845_v37 = vld [vmem:[%s3322_s6 + $0x8] sm:$0xff] }
  0xe8   : > { %v1334_v48 = vadd.f32 %v1191_v61, %v1078_v62  ;;  %v1397_v30 = vmax.f32 %v1333_v42, 0.0  ;;  %v3357_v31 = vmov 0   ;;  %v551_v46 = vmul.f32 %v2729_v41, %v404_v13  ;;  %v359_v61 = vld [vmem:[%s3317_s1 + $0xa0] sm:$0xff] }
  0xe9   : > { %1675 = vmatprep.subr.bf16.mxu0 %v1452_v38  ;;  %944 = vperm.xlu1 %2272, %v2478_v17   ;;  %v1454_v54 = vpack.c.bf16 %v1394_v5, %v1392_v9  ;;  %v1453_v11 = vpack.c.bf16 %v1393_v21, %v1391_v3  ;;  %v1514_v17 = vld [vmem:[%s3320_s4 + $0x78] sm:$0xff]  ;;  %v552_v4 = vmul.f32 %v2736_v53, %v404_v13 }
  0xea   : > { %v1186_v28 = vpop.permute.xlu0 %1185  ;;  %1676 = vmatpush1.bf16.msra.mxu0 %v1451_v39  ;;  %v1398_v29 = vmax.f32 %v1334_v48, 0.0  ;;  %v753_v8 = vmul.f32 %v2721_v36, %v2613_v50  ;;  %v751_v44 = vmul.f32 %v2721_v36, %v2748_v1  ;;  %v752_v60 = vmul.f32 %v2725_v40, %v2748_v1 }
  0xeb   : > { %v1331_v58 = vadd.f32 %v1186_v28, %v1075_v25  ;;  %v1332_v55 = vadd.f32 %v1186_v28, %v1076_v32  ;;  %1582 = vperm.xlu0 %2290, %v1512_v0   ;;  %1677 = vmatprep.subr.bf16.mxu0 %v1454_v54  ;;  %v754_v35 = vmul.f32 %v2725_v40, %v2613_v50  ;;  %v1847_v50 = vld [vmem:[%s3322_s6 + $0x18] sm:$0xff]  ;;  %v2006_v25 = vld [vmem:[%s3323_s7 + $0x8] sm:$0xff] }
  0xec   : > { %v2857_v2 = vpop.permute.xlu1 %636  ;;  %v553_v7 = vmul.f32 %v2729_v41, %v2716_v34  ;;  %v554_v47 = vmul.f32 %v2736_v53, %v2716_v34  ;;  %v815_v10 = vadd.f32 %v751_v44, %v551_v46  ;;  %v816_v13 = vadd.f32 %v752_v60, %v552_v4  ;;  %v2009_v46 = vld [vmem:[%s3323_s7 + $0x20] sm:$0xff] }
  0xed   : > { %v1395_v57 = vmax.f32 %v1331_v58, 0.0  ;;  %v1396_v43 = vmax.f32 %v1332_v55, 0.0  ;;  %2273 = vset.pattern.permute.xlu1 %v3357_v31  ;;  %v1017_v27 = vmul.f32 %v2731_v45, %v2815_v26  ;;  %v1018_v1 = vmul.f32 %v2733_v49, %v2815_v26  ;;  %v2007_v58 = vld [vmem:[%s3323_s7 + $0x10] sm:$0xff] }
  0xee   : > { %1678 = vmatpush1.bf16.msra.mxu0 %v1453_v11  ;;  %1250 = vperm.xlu1 %2273, %v1148_v15   ;;  %v2871_v6 = vpop.permute.xlu0 %418  ;;  %v1015_v34 = vmul.f32 %v2731_v45, %v2791_v16  ;;  %v1016_v38 = vmul.f32 %v2733_v49, %v2791_v16  ;;  %v817_v39 = vadd.f32 %v753_v8, %v553_v7  ;;  %v2010_v7 = vld [vmem:[%s3323_s7 + $0x28] sm:$0xff] }
  0xef   : > { %1592 = vperm.xlu0 %2290, %v1514_v17   ;;  %v1456_v33 = vpack.c.bf16 %v1398_v29, %v1396_v43  ;;  %v1455_v24 = vpack.c.bf16 %v1397_v30, %v1395_v57  ;;  %v818_v9 = vadd.f32 %v754_v35, %v554_v47  ;;  %v2008_v17 = vld [vmem:[%s3323_s7 + $0x18] sm:$0xff]  ;;  %v756_v4 = vmul.f32 %v2725_v40, %v2857_v2 }
  0xf0   : > { %v1079_v0 = vadd.f32 %v1015_v34, %v815_v10  ;;  %v1080_v5 = vadd.f32 %v1016_v38, %v816_v13  ;;  %v1081_v26 = vadd.f32 %v1017_v27, %v817_v39  ;;  %v1150_v29 = vld [vmem:[%s3318_s2 + $0x98] sm:$0xff]  ;;  %v557_v8 = vmul.f32 %v2729_v41, %v2871_v6 }
  0xf1   : > { %v2873_v63 = vpop.permute.xlu1 %900  ;;  %1679 = vmatprep.subr.bf16.mxu0 %v1456_v33  ;;  %v1082_v21 = vadd.f32 %v1018_v1, %v818_v9  ;;  %v558_v44 = vmul.f32 %v2736_v53, %v2871_v6  ;;  %v556_v35 = vmul.f32 %v2736_v53, %v2850_v12  ;;  %v2012_v38 = vld [vmem:[%s3323_s7 + $0x38] sm:$0xff] }
  0xf2   : > { %473 = vperm.xlu1 %2273, %v359_v61   ;;  %1680 = vmatpush1.bf16.msra.mxu0 %v1455_v24  ;;  %v1196_v62 = vpop.permute.xlu0 %1195  ;;  %v757_v24 = vmul.f32 %v2721_v36, %v2618_v52  ;;  %v1020_v47 = vmul.f32 %v2733_v49, %v2873_v63 }
  0xf3   : > { %1859 = vperm.xlu0 %2290, %v1845_v37   ;;  %v1335_v32 = vadd.f32 %v1196_v62, %v1079_v0  ;;  %v1336_v3 = vadd.f32 %v1196_v62, %v1080_v5  ;;  %v758_v37 = vmul.f32 %v2725_v40, %v2618_v52  ;;  %v1019_v52 = vmul.f32 %v2731_v45, %v2873_v63 }
  0xf4   : > { %v820_v10 = vadd.f32 %v756_v4, %v556_v35  ;;  %v821_v13 = vadd.f32 %v757_v24, %v557_v8 }
  0xf5   : > { %v2894_v14 = vpop.permute.xlu1 %904  ;;  %v1399_v55 = vmax.f32 %v1335_v32, 0.0  ;;  %v1400_v15 = vmax.f32 %v1336_v3, 0.0  ;;  %v822_v27 = vadd.f32 %v758_v37, %v558_v44 }
  0xf6   : > { %2274 = vset.pattern.permute.xlu1 %v3355_v51  ;;  %v429_v33 = vpop.permute.xlu0 %428  ;;  %v1021_v1 = vmul.f32 %v2731_v45, %v2894_v14  ;;  %v1084_v63 = vadd.f32 %v1020_v47, %v820_v10 }
  0xf7   : > { %1869 = vperm.xlu0 %2290, %v1847_v50   ;;  %684 = vperm.xlu1 %2274, %v359_v61  }
  0xf8   : > { %v1085_v0 = vadd.f32 %v1021_v1, %v821_v13 }
  0xfa   : > { %v1201_v42 = vpop.permute.xlu1 %1200  ;;  %v1206_v34 = vpop.permute.xlu0 %1205 }
  0xfb   : > { %v1337_v48 = vadd.f32 %v1201_v42, %v1081_v26  ;;  %v1338_v16 = vadd.f32 %v1201_v42, %v1082_v21  ;;  %2020 = vperm.xlu0 %2290, %v2006_v25   ;;  %2275 = vset.pattern.permute.xlu1 %v3356_v23  ;;  %v1340_v62 = vadd.f32 %v1206_v34, %v1084_v63 }
  0xfc   : > { %948 = vperm.xlu1 %2275, %v359_v61   ;;  %v361_v61 = vld [vmem:[%s3317_s1 + $0xb0] sm:$0xff] }
  0xfd   : > { %v1401_v28 = vmax.f32 %v1337_v48, 0.0  ;;  %v1402_v54 = vmax.f32 %v1338_v16, 0.0  ;;  %v1404_v32 = vmax.f32 %v1340_v62, 0.0 }
  0xfe   : > { %v2911_v11 = vpop.permute.xlu1 %423 }
  0xff   : > { %2025 = vperm.xlu0 %2290, %v2007_v58   ;;  %v1458_v57 = vpack.c.bf16 %v1402_v54, %v1400_v15  ;;  %v1457_v43 = vpack.c.bf16 %v1401_v28, %v1399_v55  ;;  %v1152_v58 = vld [vmem:[%s3318_s2 + $0xa8] sm:$0xff] }
 0x100   : > { %952 = vperm.xlu1 %2275, %v2484_v18   ;;  %v755_v18 = vmul.f32 %v2721_v36, %v2857_v2  ;;  %v555_v2 = vmul.f32 %v2729_v41, %v2850_v12  ;;  %v1022_v12 = vmul.f32 %v2733_v49, %v2894_v14 }
 0x101   : > { %1681 = vmatprep.subr.bf16.mxu0 %v1458_v57  ;;  %v761_v57 = vmul.f32 %v2721_v36, %v2630_v56 }
 0x102   : > { %1682 = vmatpush1.bf16.msra.mxu0 %v1457_v43  ;;  %v819_v6 = vadd.f32 %v755_v18, %v555_v2  ;;  %v1086_v5 = vadd.f32 %v1022_v12, %v822_v27  ;;  %v561_v43 = vmul.f32 %v2729_v41, %v429_v33 }
 0x103   : > { %v645_v30 = vpop.permute.xlu1 %644  ;;  %2030 = vperm.xlu0 %2290, %v2008_v17   ;;  %v562_v17 = vmul.f32 %v2736_v53, %v429_v33 }
 0x104   : > { %2276 = vset.pattern.permute.xlu1 %v3357_v31  ;;  %v1083_v39 = vadd.f32 %v1019_v52, %v819_v6  ;;  %v759_v55 = vmul.f32 %v2721_v36, %v645_v30  ;;  %v760_v15 = vmul.f32 %v2725_v40, %v645_v30  ;;  %v560_v30 = vmul.f32 %v2736_v53, %v2911_v11 }
 0x105   : > { %1260 = vperm.xlu1 %2276, %v1150_v29   ;;  %v363_v29 = vld [vmem:[%s3317_s1 + $0xc0] sm:$0xff]  ;;  %v825_v33 = vadd.f32 %v761_v57, %v561_v43 }
 0x106   : > { %v1339_v9 = vadd.f32 %v1206_v34, %v1083_v39  ;;  %v824_v37 = vadd.f32 %v760_v15, %v560_v30 }
 0x107   : > { %2035 = vperm.xlu0 %2290, %v2009_v46   ;;  %v559_v46 = vmul.f32 %v2729_v41, %v2911_v11 }
 0x108   : > { %v909_v60 = vpop.permute.xlu1 %908  ;;  %v1403_v25 = vmax.f32 %v1339_v9, 0.0 }
 0x109   : > { %483 = vperm.xlu1 %2276, %v361_v61   ;;  %v1023_v18 = vmul.f32 %v2731_v45, %v909_v60  ;;  %v1024_v4 = vmul.f32 %v2733_v49, %v909_v60  ;;  %v823_v24 = vadd.f32 %v759_v55, %v559_v46 }
 0x10b   : > { %2040 = vperm.xlu0 %2290, %v2010_v7   ;;  %v1087_v44 = vadd.f32 %v1023_v18, %v823_v24  ;;  %v1088_v2 = vadd.f32 %v1024_v4, %v824_v37 }
 0x10c   : > { %v913_v50 = vpop.permute.xlu1 %912 }
 0x10d   : > { %2277 = vset.pattern.permute.xlu1 %v3355_v51  ;;  %v1025_v35 = vmul.f32 %v2731_v45, %v913_v50  ;;  %v1026_v7 = vmul.f32 %v2733_v49, %v913_v50 }
 0x10e   : > { %692 = vperm.xlu1 %2277, %v361_v61  }
 0x10f   : > { %2050 = vperm.xlu0 %2290, %v2012_v38   ;;  %v1089_v47 = vadd.f32 %v1025_v35, %v825_v33 }
 0x111   : > { %v1211_v26 = vpop.permute.xlu1 %1210 }
 0x112   : > { %v1341_v21 = vadd.f32 %v1211_v26, %v1085_v0  ;;  %v1342_v14 = vadd.f32 %v1211_v26, %v1086_v5  ;;  %2278 = vset.pattern.permute.xlu1 %v3356_v23  ;;  %v1154_v0 = vld [vmem:[%s3318_s2 + $0xb8] sm:$0xff] }
 0x113   : > { %956 = vperm.xlu1 %2278, %v361_v61  }
 0x114   : > { %v1405_v3 = vmax.f32 %v1341_v21, 0.0  ;;  %v1406_v42 = vmax.f32 %v1342_v14, 0.0  ;;  %v765_v21 = vmul.f32 %v2721_v36, %v2637_v59 }
 0x115   : > { %v2959_v48 = vpop.permute.xlu1 %433 }
 0x116   : > { %v1460_v16 = vpack.c.bf16 %v1406_v42, %v1404_v32  ;;  %v1459_v28 = vpack.c.bf16 %v1405_v3, %v1403_v25  ;;  %v365_v32 = vld [vmem:[%s3317_s1 + $0xd0] sm:$0xff]  ;;  %v563_v3 = vmul.f32 %v2729_v41, %v2959_v48  ;;  %v564_v42 = vmul.f32 %v2736_v53, %v2959_v48 }
 0x117   : > { %960 = vperm.xlu1 %2278, %v2491_v19   ;;  %v762_v19 = vmul.f32 %v2725_v40, %v2630_v56  ;;  %v439_v56 = vpop.permute.xlu0 %438 }
 0x118   : > { %1683 = vmatprep.subr.bf16.mxu0 %v1460_v16  ;;  %v565_v14 = vmul.f32 %v2729_v41, %v439_v56  ;;  %v566_v25 = vmul.f32 %v2736_v53, %v439_v56 }
 0x119   : > { %1684 = vmatpush1.bf16.msra.mxu0 %v1459_v28  ;;  %v826_v8 = vadd.f32 %v762_v19, %v562_v17 }
 0x11a   : > { %v653_v54 = vpop.permute.xlu1 %652  ;;  %v829_v15 = vadd.f32 %v765_v21, %v565_v14 }
 0x11b   : > { %2279 = vset.pattern.permute.xlu1 %v3357_v31  ;;  %v1216_v11 = vpop.permute.xlu0 %1215  ;;  %v1090_v60 = vadd.f32 %v1026_v7, %v826_v8  ;;  %v763_v5 = vmul.f32 %v2721_v36, %v653_v54  ;;  %v764_v26 = vmul.f32 %v2725_v40, %v653_v54 }
 0x11c   : > { %1270 = vperm.xlu1 %2279, %v1152_v58   ;;  %v1344_v6 = vadd.f32 %v1216_v11, %v1088_v2  ;;  %v1343_v10 = vadd.f32 %v1216_v11, %v1087_v44 }
 0x11d   : > { %v827_v58 = vadd.f32 %v763_v5, %v563_v3  ;;  %v828_v55 = vadd.f32 %v764_v26, %v564_v42 }
 0x11e   : > { %v1408_v38 = vmax.f32 %v1344_v6, 0.0  ;;  %v1407_v39 = vmax.f32 %v1343_v10, 0.0  ;;  %v3358_v10 = vld [vmem:[#allocation3_spill] sm:$0xff] }
 0x11f   : > { %v917_v61 = vpop.permute.xlu1 %916 }
 0x120   : > { %493 = vperm.xlu1 %2279, %v363_v29   ;;  %v1027_v16 = vmul.f32 %v2731_v45, %v917_v61  ;;  %v1028_v28 = vmul.f32 %v2733_v49, %v917_v61 }
 0x122   : > { %v1091_v19 = vadd.f32 %v1027_v16, %v827_v58  ;;  %v1092_v43 = vadd.f32 %v1028_v28, %v828_v55 }
 0x123   : > { %v921_v52 = vpop.permute.xlu1 %920 }
 0x124   : > { %2280 = vset.pattern.permute.xlu1 %v3355_v51  ;;  %v1029_v17 = vmul.f32 %v2731_v45, %v921_v52 }
 0x125   : > { %700 = vperm.xlu1 %2280, %v363_v29  }
 0x126   : > { %v1093_v30 = vadd.f32 %v1029_v17, %v829_v15 }
 0x128   : > { %v1221_v13 = vpop.permute.xlu1 %1220 }
 0x129   : > { %v1345_v27 = vadd.f32 %v1221_v13, %v1089_v47  ;;  %v1346_v1 = vadd.f32 %v1221_v13, %v1090_v60  ;;  %2281 = vset.pattern.permute.xlu1 %v3356_v23  ;;  %v1156_v47 = vld [vmem:[%s3318_s2 + $0xc8] sm:$0xff]  ;;  %v769_v13 = vmul.f32 %v2721_v36, %v3358_v10 }
 0x12a   : > { %964 = vperm.xlu1 %2281, %v363_v29   ;;  %v1030_v29 = vmul.f32 %v2733_v49, %v921_v52 }
 0x12b   : > { %v1409_v12 = vmax.f32 %v1345_v27, 0.0  ;;  %v1410_v34 = vmax.f32 %v1346_v1, 0.0 }
 0x12c   : > { %v2987_v50 = vpop.permute.xlu1 %443 }
 0x12d   : > { %v1462_v63 = vpack.c.bf16 %v1410_v34, %v1408_v38  ;;  %v1461_v9 = vpack.c.bf16 %v1409_v12, %v1407_v39  ;;  %v367_v12 = vld [vmem:[%s3317_s1 + $0xe0] sm:$0xff]  ;;  %v567_v34 = vmul.f32 %v2729_v41, %v2987_v50  ;;  %v568_v38 = vmul.f32 %v2736_v53, %v2987_v50 }
 0x12e   : > { %968 = vperm.xlu1 %2281, %v2498_v20   ;;  %v766_v20 = vmul.f32 %v2725_v40, %v2637_v59  ;;  %v449_v59 = vpop.permute.xlu0 %448 }
 0x12f   : > { %1685 = vmatprep.subr.bf16.mxu0 %v1462_v63  ;;  %v569_v27 = vmul.f32 %v2729_v41, %v449_v59  ;;  %v570_v1 = vmul.f32 %v2736_v53, %v449_v59 }
 0x130   : > { %1686 = vmatpush1.bf16.msra.mxu0 %v1461_v9  ;;  %v830_v57 = vadd.f32 %v766_v20, %v566_v25 }
 0x131   : > { %v661_v62 = vpop.permute.xlu1 %660  ;;  %v833_v26 = vadd.f32 %v769_v13, %v569_v27 }
 0x132   : > { %2282 = vset.pattern.permute.xlu1 %v3357_v31  ;;  %v1226_v48 = vpop.permute.xlu0 %1225  ;;  %v1094_v18 = vadd.f32 %v1030_v29, %v830_v57  ;;  %v767_v60 = vmul.f32 %v2721_v36, %v661_v62  ;;  %v768_v6 = vmul.f32 %v2725_v40, %v661_v62 }
 0x133   : > { %1280 = vperm.xlu1 %2282, %v1154_v0   ;;  %v1348_v4 = vadd.f32 %v1226_v48, %v1092_v43  ;;  %v1347_v61 = vadd.f32 %v1226_v48, %v1091_v19  ;;  %v2329_v48 = vld [vmem:[%s3317_s1 + $0xe8] sm:$0xff] }
 0x134   : > { %v831_v0 = vadd.f32 %v767_v60, %v567_v34  ;;  %v832_v5 = vadd.f32 %v768_v6, %v568_v38 }
 0x135   : > { %v1412_v44 = vmax.f32 %v1348_v4, 0.0  ;;  %v1411_v2 = vmax.f32 %v1347_v61, 0.0 }
 0x136   : > { %v925_v54 = vpop.permute.xlu1 %924  ;;  %v459_v62 = vpop.permute.xlu0 %458 }
 0x137   : > { %503 = vperm.xlu1 %2282, %v365_v32   ;;  %v1031_v39 = vmul.f32 %v2731_v45, %v925_v54  ;;  %v1032_v63 = vmul.f32 %v2733_v49, %v925_v54  ;;  %v574_v60 = vmul.f32 %v2736_v53, %v459_v62 }
 0x139   : > { %v1095_v20 = vadd.f32 %v1031_v39, %v831_v0  ;;  %v1096_v14 = vadd.f32 %v1032_v63, %v832_v5 }
 0x13a   : > { %v929_v46 = vpop.permute.xlu1 %928  ;;  %v1236_v50 = vpop.permute.xlu0 %1235 }
 0x13b   : > { %2283 = vset.pattern.permute.xlu1 %v3355_v51  ;;  %v1033_v25 = vmul.f32 %v2731_v45, %v929_v46  ;;  %v1352_v28 = vadd.f32 %v1236_v50, %v1096_v14  ;;  %v1351_v54 = vadd.f32 %v1236_v50, %v1095_v20  ;;  %v2330_v50 = vld [vmem:[%s3317_s1 + $0xf8] sm:$0xff] }
 0x13c   : > { %708 = vperm.xlu1 %2283, %v365_v32  }
 0x13d   : > { %v1097_v42 = vadd.f32 %v1033_v25, %v833_v26  ;;  %v1416_v19 = vmax.f32 %v1352_v28, 0.0  ;;  %v1415_v43 = vmax.f32 %v1351_v54, 0.0  ;;  %v1161_v54 = vld [vmem:[%s3318_s2 + $0xf0] sm:$0xff] }
 0x13f   : > { %v1231_v56 = vpop.permute.xlu1 %1230 }
 0x140   : > { %v1349_v24 = vadd.f32 %v1231_v56, %v1093_v30  ;;  %v1350_v37 = vadd.f32 %v1231_v56, %v1094_v18  ;;  %2284 = vset.pattern.permute.xlu1 %v3356_v23  ;;  %v1158_v30 = vld [vmem:[%s3318_s2 + $0xd8] sm:$0xff]  ;;  %v369_v56 = vld [vmem:[%s3317_s1 + $0xf0] sm:$0xff] }
 0x141   : > { %972 = vperm.xlu1 %2284, %v365_v32   ;;  %v1034_v32 = vmul.f32 %v2733_v49, %v929_v46 }
 0x142   : > { %v1413_v33 = vmax.f32 %v1349_v24, 0.0  ;;  %v1414_v8 = vmax.f32 %v1350_v37, 0.0 }
 0x143   : > { %v3015_v35 = vpop.permute.xlu1 %453 }
 0x144   : > { %v1464_v7 = vpack.c.bf16 %v1414_v8, %v1412_v44  ;;  %v1463_v52 = vpack.c.bf16 %v1413_v33, %v1411_v2  ;;  %v571_v24 = vmul.f32 %v2729_v41, %v3015_v35  ;;  %v572_v37 = vmul.f32 %v2736_v53, %v3015_v35  ;;  %v3359_v2 = vld [vmem:[#allocation4_spill] sm:$0xff] }
 0x145   : > { %976 = vperm.xlu1 %2284, %v2507_v22   ;;  %v770_v22 = vmul.f32 %v2725_v40, %v3358_v10 }
 0x146   : > { %1687 = vmatprep.subr.bf16.mxu0 %v1464_v7  ;;  %v773_v7 = vmul.f32 %v2721_v36, %v3359_v2 }
 0x147   : > { %1688 = vmatpush1.bf16.msra.mxu0 %v1463_v52  ;;  %v834_v21 = vadd.f32 %v770_v22, %v570_v1  ;;  %v774_v52 = vmul.f32 %v2725_v40, %v3359_v2  ;;  %v1501_v2 = vld [vmem:[%s3320_s4 + $0x10] sm:$0xff] }
 0x148   : > { %v669_v11 = vpop.permute.xlu1 %668 }
 0x149   : > { %2285 = vset.pattern.permute.xlu1 %v3357_v31  ;;  %v1098_v16 = vadd.f32 %v1034_v32, %v834_v21  ;;  %v771_v4 = vmul.f32 %v2721_v36, %v669_v11  ;;  %v772_v61 = vmul.f32 %v2725_v40, %v669_v11  ;;  %v469_v11 = vpop.permute.xlu0 %468  ;;  %v838_v34 = vadd.f32 %v774_v52, %v574_v60 }
 0x14a   : > { %1290 = vperm.xlu1 %2285, %v1156_v47   ;;  %v573_v47 = vmul.f32 %v2729_v41, %v459_v62 }
 0x14b   : > { %v835_v6 = vadd.f32 %v771_v4, %v571_v24  ;;  %v836_v10 = vadd.f32 %v772_v61, %v572_v37 }
 0x14d   : > { %v933_v9 = vpop.permute.xlu1 %932  ;;  %v1246_v38 = vpop.permute.xlu0 %1245 }
 0x14e   : > { %513 = vperm.xlu1 %2285, %v367_v12   ;;  %v1035_v33 = vmul.f32 %v2731_v45, %v933_v9  ;;  %v1036_v8 = vmul.f32 %v2733_v49, %v933_v9 }
 0x150   : > { %v1099_v35 = vadd.f32 %v1035_v33, %v835_v6  ;;  %v1100_v13 = vadd.f32 %v1036_v8, %v836_v10  ;;  %v2295_v6 = vld [vmem:[%s3319_s3 + $0x4] ss:$8 sps:$4 sm:$0xff]  }
 0x151   : > { %v937_v3 = vpop.permute.xlu1 %936  ;;  %1707 = vmatprep.mubr.bf16.mxu0 %v2295_v6 }
 0x152   : > { %2286 = vset.pattern.permute.xlu1 %v3355_v51  ;;  %v1037_v22 = vmul.f32 %v2731_v45, %v937_v3  ;;  %v1038_v27 = vmul.f32 %v2733_v49, %v937_v3  ;;  %v1356_v9 = vadd.f32 %v1246_v38, %v1100_v13  ;;  %v1355_v0 = vadd.f32 %v1246_v38, %v1099_v35 }
 0x153   : > { %716 = vperm.xlu1 %2286, %v367_v12  }
 0x154   : > { %v1102_v63 = vadd.f32 %v1038_v27, %v838_v34  ;;  %v1420_v14 = vmax.f32 %v1356_v9, 0.0  ;;  %v1419_v25 = vmax.f32 %v1355_v0, 0.0 }
 0x156   : > { %v1241_v59 = vpop.permute.xlu1 %1240 }
 0x157   : > { %v1353_v58 = vadd.f32 %v1241_v59, %v1097_v42  ;;  %v1354_v55 = vadd.f32 %v1241_v59, %v1098_v16  ;;  %2287 = vset.pattern.permute.xlu1 %v3356_v23 }
 0x158   : > { %980 = vperm.xlu1 %2287, %v367_v12   ;;  %v837_v12 = vadd.f32 %v773_v7, %v573_v47 }
 0x159   : > { %v1417_v15 = vmax.f32 %v1353_v58, 0.0  ;;  %v1418_v57 = vmax.f32 %v1354_v55, 0.0 }
 0x15a   : > { %v3043_v17 = vpop.permute.xlu1 %463  ;;  %v1101_v39 = vadd.f32 %v1037_v22, %v837_v12  ;;  %v1503_v22 = vld [vmem:[%s3320_s4 + $0x20] sm:$0xff] }
 0x15b   : > { %v1466_v29 = vpack.c.bf16 %v1418_v57, %v1416_v19  ;;  %v1465_v46 = vpack.c.bf16 %v1417_v15, %v1415_v43  ;;  %v575_v59 = vmul.f32 %v2729_v41, %v3043_v17  ;;  %v576_v58 = vmul.f32 %v2736_v53, %v3043_v17  ;;  %v3360_v19 = vld [vmem:[#allocation5_spill] sm:$0xff]  ;;  %v1499_v17 = vld [vmem:[%s3320_s4] sm:$0xff] }
 0x15c   : > { %984 = vperm.xlu1 %2287, %v2329_v48   ;;  %v777_v43 = vmul.f32 %v2721_v36, %v3360_v19  ;;  %v577_v48 = vmul.f32 %v2729_v41, %v469_v11 }
 0x15d   : > { %1689 = vmatprep.subr.bf16.mxu0 %v1466_v29  ;;  %v778_v29 = vmul.f32 %v2725_v40, %v3360_v19 }
 0x15e   : > { %1690 = vmatpush1.bf16.msra.mxu0 %v1465_v46  ;;  %v479_v46 = vpop.permute.xlu0 %478  ;;  %v841_v8 = vadd.f32 %v777_v43, %v577_v48 }
 0x15f   : > { %v677_v18 = vpop.permute.xlu1 %676 }
 0x160   : > { %2288 = vset.pattern.permute.xlu1 %v3357_v31  ;;  %v775_v16 = vmul.f32 %v2721_v36, %v677_v18  ;;  %v776_v28 = vmul.f32 %v2725_v40, %v677_v18 }
 0x161   : > { %1300 = vperm.xlu1 %2288, %v1158_v30   ;;  %v578_v30 = vmul.f32 %v2736_v53, %v469_v11 }
 0x162   : > { %v839_v18 = vadd.f32 %v775_v16, %v575_v59  ;;  %v840_v4 = vadd.f32 %v776_v28, %v576_v58  ;;  %v1256_v7 = vpop.permute.xlu0 %1255  ;;  %v581_v28 = vmul.f32 %v2729_v41, %v479_v46 }
 0x164   : > { %v941_v44 = vpop.permute.xlu1 %940 }
 0x165   : > { %523 = vperm.xlu1 %2288, %v369_v56   ;;  %v1039_v55 = vmul.f32 %v2731_v45, %v941_v44  ;;  %v1040_v15 = vmul.f32 %v2733_v49, %v941_v44  ;;  %v842_v44 = vadd.f32 %v778_v29, %v578_v30 }
 0x166   : > { %v489_v16 = vpop.permute.xlu0 %488 }
 0x167   : > { %v1103_v61 = vadd.f32 %v1039_v55, %v839_v18 }
 0x168   : > { %v945_v1 = vpop.permute.xlu1 %944 }
 0x169   : > { %2289 = vset.pattern.permute.xlu1 %v3355_v51  ;;  %v1041_v24 = vmul.f32 %v2731_v45, %v945_v1  ;;  %v1042_v37 = vmul.f32 %v2733_v49, %v945_v1  ;;  %v1359_v60 = vadd.f32 %v1256_v7, %v1103_v61 }
 0x16a   : > { %724 = vperm.xlu1 %2289, %v369_v56   ;;  %v1266_v30 = vpop.permute.xlu0 %1265 }
 0x16b   : > { %v1105_v52 = vadd.f32 %v1041_v24, %v841_v8  ;;  %v1106_v11 = vadd.f32 %v1042_v37, %v842_v44  ;;  %v1423_v34 = vmax.f32 %v1359_v60, 0.0  ;;  %v1846_v60 = vld [vmem:[%s3322_s6 + $0x10] sm:$0xff] }
 0x16d   : > { %v1251_v62 = vpop.permute.xlu1 %1250 }
 0x16e   : > { %v1357_v5 = vadd.f32 %v1251_v62, %v1101_v39  ;;  %v1358_v26 = vadd.f32 %v1251_v62, %v1102_v63  ;;  %2291 = vset.pattern.permute.xlu1 %v3356_v23  ;;  %v1160_v23 = vld [vmem:[%s3318_s2 + $0xe8] sm:$0xff]  ;;  %v1505_v63 = vld [vmem:[%s3320_s4 + $0x30] sm:$0xff]  ;;  %v1507_v62 = vld [vmem:[%s3320_s4 + $0x40] sm:$0xff] }
 0x16f   : > { %988 = vperm.xlu1 %2291, %v369_v56   ;;  %v1104_v56 = vadd.f32 %v1040_v15, %v840_v4 }
 0x170   : > { %v1421_v21 = vmax.f32 %v1357_v5, 0.0  ;;  %v1422_v20 = vmax.f32 %v1358_v26, 0.0 }
 0x171   : > { %v3073_v32 = vpop.permute.xlu1 %473  ;;  %v1360_v47 = vadd.f32 %v1256_v7, %v1104_v56 }
 0x172   : > { %v1468_v51 = vpack.c.bf16 %v1422_v20, %v1420_v14  ;;  %v1467_v3 = vpack.c.bf16 %v1421_v21, %v1419_v25  ;;  %v1509_v21 = vld [vmem:[%s3320_s4 + $0x50] sm:$0xff]  ;;  %v579_v20 = vmul.f32 %v2729_v41, %v3073_v32  ;;  %v580_v14 = vmul.f32 %v2736_v53, %v3073_v32  ;;  %v1511_v32 = vld [vmem:[%s3320_s4 + $0x60] sm:$0xff] }
 0x173   : > { %992 = vperm.xlu1 %2291, %v2330_v50   ;;  %v1424_v12 = vmax.f32 %v1360_v47, 0.0  ;;  %v3361_v50 = vld [vmem:[#allocation6_spill] sm:$0xff] }
 0x174   : > { %1691 = vmatprep.subr.bf16.mxu0 %v1468_v51 }
 0x175   : > { %1692 = vmatpush1.bf16.msra.mxu0 %v1467_v3 }
 0x176   : > { %v685_v42 = vpop.permute.xlu1 %684 }
 0x177   : > { %2292 = vset.pattern.permute.xlu1 %v3357_v31  ;;  %v779_v5 = vmul.f32 %v2721_v36, %v685_v42  ;;  %v780_v26 = vmul.f32 %v2725_v40, %v685_v42  ;;  %v782_v42 = vmul.f32 %v2725_v40, %v3361_v50 }
 0x178   : > { %1310 = vperm.xlu1 %2292, %v1160_v23   ;;  %v781_v23 = vmul.f32 %v2721_v36, %v3361_v50  ;;  %v1849_v50 = vld [vmem:[%s3322_s6 + $0x28] sm:$0xff] }
 0x179   : > { %v843_v59 = vadd.f32 %v779_v5, %v579_v20  ;;  %v844_v58 = vadd.f32 %v780_v26, %v580_v14  ;;  %v585_v5 = vmul.f32 %v2729_v41, %v489_v16 }
 0x17a   : > { %v845_v29 = vadd.f32 %v781_v23, %v581_v28 }
 0x17b   : > { %v949_v57 = vpop.permute.xlu1 %948 }
 0x17c   : > { %1315 = vperm.xlu1 %2292, %v1161_v54   ;;  %v1043_v25 = vmul.f32 %v2731_v45, %v949_v57  ;;  %v1044_v51 = vmul.f32 %v2733_v49, %v949_v57  ;;  %v582_v54 = vmul.f32 %v2736_v53, %v479_v46  ;;  %v1513_v46 = vld [vmem:[%s3320_s4 + $0x70] sm:$0xff] }
 0x17e   : > { %v1107_v55 = vadd.f32 %v1043_v25, %v843_v59  ;;  %v1108_v15 = vadd.f32 %v1044_v51, %v844_v58  ;;  %v846_v48 = vadd.f32 %v782_v42, %v582_v54 }
 0x17f   : > { %v953_v33 = vpop.permute.xlu1 %952 }
 0x180   : > { %1517 = vperm.xlu1 %2292, %v1499_v17   ;;  %v1045_v57 = vmul.f32 %v2731_v45, %v953_v33  ;;  %v1046_v19 = vmul.f32 %v2733_v49, %v953_v33  ;;  %v1363_v18 = vadd.f32 %v1266_v30, %v1107_v55  ;;  %v1364_v4 = vadd.f32 %v1266_v30, %v1108_v15  ;;  %v1844_v33 = vld [vmem:[%s3322_s6] sm:$0xff] }
 0x182   : > { %v1109_v17 = vadd.f32 %v1045_v57, %v845_v29  ;;  %v1110_v61 = vadd.f32 %v1046_v19, %v846_v48  ;;  %v1427_v7 = vmax.f32 %v1363_v18, 0.0  ;;  %v1851_v29 = vld [vmem:[%s3322_s6 + $0x38] sm:$0xff] }
 0x184   : > { %1527 = vperm.xlu1 %2292, %v1501_v2   ;;  %v1261_v10 = vpop.permute.xlu1 %1260  ;;  %v1428_v2 = vmax.f32 %v1364_v4, 0.0 }
 0x185   : > { %v1361_v35 = vadd.f32 %v1261_v10, %v1105_v52  ;;  %v1362_v13 = vadd.f32 %v1261_v10, %v1106_v11  ;;  %v2005_v10 = vld [vmem:[%s3323_s7] sm:$0xff] }
 0x187   : > { %v1425_v27 = vmax.f32 %v1361_v35, 0.0  ;;  %v1426_v1 = vmax.f32 %v1362_v13, 0.0 }
 0x188   : > { %1537 = vperm.xlu1 %2292, %v1503_v22   ;;  %v3113_v38 = vpop.permute.xlu1 %483 }
 0x189   : > { %v1470_v39 = vpack.c.bf16 %v1426_v1, %v1424_v12  ;;  %v1469_v9 = vpack.c.bf16 %v1425_v27, %v1423_v34  ;;  %v583_v22 = vmul.f32 %v2729_v41, %v3113_v38  ;;  %v584_v27 = vmul.f32 %v2736_v53, %v3113_v38 }
 0x18a   : > { %v586_v38 = vmul.f32 %v2736_v53, %v489_v16 }
 0x18b   : > { %1693 = vmatprep.subr.bf16.mxu0 %v1470_v39  ;;  %v1848_v39 = vld [vmem:[%s3322_s6 + $0x20] sm:$0xff] }
 0x18c   : > { %1547 = vperm.xlu1 %2292, %v1505_v63   ;;  %1694 = vmatpush1.bf16.msra.mxu0 %v1469_v9  ;;  %v3362_v63 = vld [vmem:[#allocation7_spill] sm:$0xff] }
 0x18d   : > { %v693_v0 = vpop.permute.xlu1 %692  ;;  %v785_v9 = vmul.f32 %v2721_v36, %v3362_v63 }
 0x18e   : > { %v783_v35 = vmul.f32 %v2721_v36, %v693_v0  ;;  %v784_v13 = vmul.f32 %v2725_v40, %v693_v0  ;;  %v786_v0 = vmul.f32 %v2725_v40, %v3362_v63 }
 0x18f   : > { %v849_v23 = vadd.f32 %v785_v9, %v585_v5 }
 0x190   : > { %1557 = vperm.xlu1 %2292, %v1507_v62   ;;  %v499_v62 = vpop.permute.xlu0 %498  ;;  %v847_v26 = vadd.f32 %v783_v35, %v583_v22  ;;  %v850_v42 = vadd.f32 %v786_v0, %v586_v38 }
 0x191   : > { %v590_v35 = vmul.f32 %v2736_v53, %v499_v62 }
 0x192   : > { %v957_v3 = vpop.permute.xlu1 %956 }
 0x193   : > { %v1047_v1 = vmul.f32 %v2731_v45, %v957_v3  ;;  %v1048_v12 = vmul.f32 %v2733_v49, %v957_v3 }
 0x194   : > { %1567 = vperm.xlu1 %2292, %v1509_v21   ;;  %v848_v21 = vadd.f32 %v784_v13, %v584_v27  ;;  %v1276_v28 = vpop.permute.xlu0 %1275 }
 0x195   : > { %v1111_v20 = vadd.f32 %v1047_v1, %v847_v26 }
 0x196   : > { %v961_v43 = vpop.permute.xlu1 %960  ;;  %v1112_v14 = vadd.f32 %v1048_v12, %v848_v21 }
 0x197   : > { %v1049_v25 = vmul.f32 %v2731_v45, %v961_v43  ;;  %v1050_v51 = vmul.f32 %v2733_v49, %v961_v43  ;;  %v1367_v54 = vadd.f32 %v1276_v28, %v1111_v20 }
 0x198   : > { %1577 = vperm.xlu1 %2292, %v1511_v32   ;;  %v1368_v16 = vadd.f32 %v1276_v28, %v1112_v14  ;;  %v1850_v32 = vld [vmem:[%s3322_s6 + $0x30] sm:$0xff] }
 0x199   : > { %v1113_v59 = vadd.f32 %v1049_v25, %v849_v23  ;;  %v1114_v58 = vadd.f32 %v1050_v51, %v850_v42  ;;  %v1431_v30 = vmax.f32 %v1367_v54, 0.0 }
 0x19a   : > { %v1432_v48 = vmax.f32 %v1368_v16, 0.0 }
 0x19b   : > { %v1271_v56 = vpop.permute.xlu1 %1270 }
 0x19c   : > { %v1365_v24 = vadd.f32 %v1271_v56, %v1109_v17  ;;  %v1366_v37 = vadd.f32 %v1271_v56, %v1110_v61  ;;  %1587 = vperm.xlu1 %2292, %v1513_v46   ;;  %v2011_v17 = vld [vmem:[%s3323_s7 + $0x30] sm:$0xff]  ;;  %v2095_v56 = vld [vmem:[#allocation2] sm:$0x1] }
 0x19e   : > { %v1429_v8 = vmax.f32 %v1365_v24, 0.0  ;;  %v1430_v44 = vmax.f32 %v1366_v37, 0.0 }
 0x19f   : > { %v3149_v52 = vpop.permute.xlu1 %493 }
 0x1a0   : > { %1854 = vperm.xlu1 %2292, %v1844_v33   ;;  %v1472_v11 = vpack.c.bf16 %v1430_v44, %v1428_v2  ;;  %v1471_v47 = vpack.c.bf16 %v1429_v8, %v1427_v7  ;;  %v587_v33 = vmul.f32 %v2729_v41, %v3149_v52  ;;  %v588_v8 = vmul.f32 %v2736_v53, %v3149_v52 }
 0x1a2   : > { %1695 = vmatprep.subr.bf16.mxu0 %v1472_v11  ;;  %v3363_v11 = vld [vmem:[#allocation8_spill] sm:$0xff] }
 0x1a3   : > { %1696 = vmatpush1.bf16.msra.mxu0 %v1471_v47  ;;  %v789_v47 = vmul.f32 %v2721_v36, %v3363_v11 }
 0x1a4   : > { %1864 = vperm.xlu1 %2292, %v1846_v60   ;;  %v701_v6 = vpop.permute.xlu1 %700  ;;  %v790_v60 = vmul.f32 %v2725_v40, %v3363_v11 }
 0x1a5   : > { %v787_v24 = vmul.f32 %v2721_v36, %v701_v6  ;;  %v788_v37 = vmul.f32 %v2725_v40, %v701_v6  ;;  %v589_v6 = vmul.f32 %v2729_v41, %v499_v62 }
 0x1a6   : > { %v854_v63 = vadd.f32 %v790_v60, %v590_v35 }
 0x1a7   : > { %v851_v13 = vadd.f32 %v787_v24, %v587_v33  ;;  %v852_v22 = vadd.f32 %v788_v37, %v588_v8 }
 0x1a8   : > { %2015 = vperm.xlu1 %2292, %v2005_v10   ;;  %v509_v10 = vpop.permute.xlu0 %508 }
 0x1a9   : > { %v965_v34 = vpop.permute.xlu1 %964 }
 0x1aa   : > { %v1051_v44 = vmul.f32 %v2731_v45, %v965_v34  ;;  %v1052_v2 = vmul.f32 %v2733_v49, %v965_v34 }
 0x1ac   : > { %1874 = vperm.xlu1 %2292, %v1848_v39   ;;  %v1115_v52 = vadd.f32 %v1051_v44, %v851_v13  ;;  %v1116_v27 = vadd.f32 %v1052_v2, %v852_v22  ;;  %v853_v39 = vadd.f32 %v789_v47, %v589_v6  ;;  %v1286_v9 = vpop.permute.xlu0 %1285 }
 0x1ad   : > { %v969_v3 = vpop.permute.xlu1 %968 }
 0x1ae   : > { %v1053_v1 = vmul.f32 %v2731_v45, %v969_v3  ;;  %v1054_v12 = vmul.f32 %v2733_v49, %v969_v3  ;;  %v1371_v0 = vadd.f32 %v1286_v9, %v1115_v52  ;;  %v1372_v5 = vadd.f32 %v1286_v9, %v1116_v27 }
 0x1b0   : > { %1879 = vperm.xlu1 %2292, %v1849_v50   ;;  %v1117_v38 = vadd.f32 %v1053_v1, %v853_v39  ;;  %v1118_v26 = vadd.f32 %v1054_v12, %v854_v63  ;;  %v1436_v51 = vmax.f32 %v1372_v5, 0.0  ;;  %v1435_v50 = vmax.f32 %v1371_v0, 0.0 }
 0x1b2   : > { %v1281_v55 = vpop.permute.xlu1 %1280 }
 0x1b3   : > { %v1369_v15 = vadd.f32 %v1281_v55, %v1113_v59  ;;  %v1370_v57 = vadd.f32 %v1281_v55, %v1114_v58 }
 0x1b4   : > { %1884 = vperm.xlu1 %2292, %v1850_v32  }
 0x1b5   : > { %v1433_v19 = vmax.f32 %v1369_v15, 0.0  ;;  %v1434_v43 = vmax.f32 %v1370_v57, 0.0  ;;  %v3364_v57 = vld [vmem:[#allocation10_spill] sm:$0xff] }
 0x1b6   : > { %v504_v46 = vpop.permute.xlu1 %503 }
 0x1b7   : > { %v1474_v18 = vpack.c.bf16 %v1434_v43, %v1432_v48  ;;  %v1473_v4 = vpack.c.bf16 %v1433_v19, %v1431_v30  ;;  %v591_v59 = vmul.f32 %v2729_v41, %v504_v46  ;;  %v592_v58 = vmul.f32 %v2736_v53, %v504_v46 }
 0x1b8   : > { %1889 = vperm.xlu1 %2292, %v1851_v29   ;;  %v793_v19 = vmul.f32 %v2721_v36, %v3364_v57  ;;  %v794_v43 = vmul.f32 %v2725_v40, %v3364_v57  ;;  %v519_v29 = vpop.permute.xlu0 %518  ;;  %v593_v48 = vmul.f32 %v2729_v41, %v509_v10  ;;  %v594_v30 = vmul.f32 %v2736_v53, %v509_v10 }
 0x1b9   : > { %1697 = vmatprep.subr.bf16.mxu0 %v1474_v18 }
 0x1ba   : > { %1698 = vmatpush1.bf16.msra.mxu0 %v1473_v4  ;;  %v857_v37 = vadd.f32 %v793_v19, %v593_v48  ;;  %v858_v33 = vadd.f32 %v794_v43, %v594_v30 }
 0x1bb   : > { %v709_v61 = vpop.permute.xlu1 %708 }
 0x1bc   : > { %2045 = vperm.xlu1 %2292, %v2011_v17   ;;  %v791_v54 = vmul.f32 %v2721_v36, %v709_v61  ;;  %v792_v16 = vmul.f32 %v2725_v40, %v709_v61  ;;  %v1296_v8 = vpop.permute.xlu0 %1295 }
 0x1be   : > { %v855_v18 = vadd.f32 %v791_v54, %v591_v59  ;;  %v856_v4 = vadd.f32 %v792_v16, %v592_v58 }
 0x1c0   : > { %2098 = vperm.xlu1 %2292, %v2095_v56   ;;  %v973_v7 = vpop.permute.xlu1 %972 }
 0x1c1   : > { %v1055_v32 = vmul.f32 %v2731_v45, %v973_v7  ;;  %v1056_v55 = vmul.f32 %v2733_v49, %v973_v7 }
 0x1c3   : > { %v1119_v17 = vadd.f32 %v1055_v32, %v855_v18  ;;  %v1120_v46 = vadd.f32 %v1056_v55, %v856_v4 }
 0x1c4   : > { %v977_v34 = vpop.permute.xlu1 %976 }
 0x1c5   : > { %v1057_v61 = vmul.f32 %v2731_v45, %v977_v34  ;;  %v1058_v56 = vmul.f32 %v2733_v49, %v977_v34  ;;  %v1375_v44 = vadd.f32 %v1296_v8, %v1119_v17  ;;  %v1376_v2 = vadd.f32 %v1296_v8, %v1120_v46 }
 0x1c7   : > { %v1121_v7 = vadd.f32 %v1057_v61, %v857_v37  ;;  %v1122_v11 = vadd.f32 %v1058_v56, %v858_v33  ;;  %v1440_v13 = vmax.f32 %v1376_v2, 0.0  ;;  %v1439_v22 = vmax.f32 %v1375_v44, 0.0 }
 0x1c9   : > { %v1291_v21 = vpop.permute.xlu1 %1290 }
 0x1ca   : > { %v1373_v20 = vadd.f32 %v1291_v21, %v1117_v38  ;;  %v1374_v14 = vadd.f32 %v1291_v21, %v1118_v26  ;;  %v3365_v38 = vld [vmem:[#allocation11_spill] sm:$0xff] }
 0x1cb   : > { %v797_v26 = vmul.f32 %v2721_v36, %v3365_v38  ;;  %v798_v21 = vmul.f32 %v2725_v40, %v3365_v38  ;;  %v2293_v38 = vld [vmem:[%s3319_s3] ss:$8 sps:$4 sm:$0xff]  }
 0x1cc   : > { %v1437_v62 = vmax.f32 %v1373_v20, 0.0  ;;  %v1438_v25 = vmax.f32 %v1374_v14, 0.0  ;;  %v529_v20 = vpop.permute.xlu0 %528  ;;  %v597_v14 = vmul.f32 %v2729_v41, %v519_v29 }
 0x1cd   : > { %v514_v23 = vpop.permute.xlu1 %513  ;;  %v602_v54 = vmul.f32 %v2736_v53, %v529_v20 }
 0x1ce   : > { %v1476_v42 = vpack.c.bf16 %v1438_v25, %v1436_v51  ;;  %v1475_v28 = vpack.c.bf16 %v1437_v62, %v1435_v50  ;;  %v595_v63 = vmul.f32 %v2729_v41, %v514_v23  ;;  %v596_v9 = vmul.f32 %v2736_v53, %v514_v23 }
 0x1cf   : > { %v598_v62 = vmul.f32 %v2736_v53, %v519_v29  ;;  %v861_v58 = vadd.f32 %v797_v26, %v597_v14  ;;  %v2296_v26 = vld [vmem:[%s3319_s3 + $0x14] ss:$8 sps:$4 sm:$0xff]   ;;  %v2301_v14 = vld [vmem:[%s3319_s3 + $0x20] ss:$8 sps:$4 sm:$0xff]  }
 0x1d0   : > { %1699 = vmatprep.subr.bf16.mxu0 %v1476_v42  ;;  %v3366_v42 = vld [vmem:[#allocation13_spill] sm:$0xff]  ;;  %v1306_v19 = vpop.permute.xlu0 %1305 }
 0x1d1   : > { %1700 = vmatpush1.bf16.msra.mxu0 %v1475_v28  ;;  %v801_v23 = vmul.f32 %v2721_v36, %v3366_v42  ;;  %v802_v28 = vmul.f32 %v2725_v40, %v3366_v42  ;;  %v862_v32 = vadd.f32 %v798_v21, %v598_v62  ;;  %v2298_v21 = vld [vmem:[%s3319_s3 + $0x10] ss:$8 sps:$4 sm:$0xff]   ;;  %v2302_v62 = vld [vmem:[%s3319_s3 + $0x34] ss:$8 sps:$4 sm:$0xff]  }
 0x1d2   : > { %v717_v3 = vpop.permute.xlu1 %716  ;;  %v2308_v42 = vld [vmem:[%s3319_s3 + $0x54] ss:$8 sps:$4 sm:$0xff]  }
 0x1d3   : > { %v795_v34 = vmul.f32 %v2721_v36, %v717_v3  ;;  %v796_v39 = vmul.f32 %v2725_v40, %v717_v3  ;;  %v601_v3 = vmul.f32 %v2729_v41, %v529_v20  ;;  %v866_v4 = vadd.f32 %v802_v28, %v602_v54  ;;  %v2299_v20 = vld [vmem:[%s3319_s3 + $0x24] ss:$8 sps:$4 sm:$0xff]   ;;  %v2314_v54 = vld [vmem:[%s3319_s3 + $0x74] ss:$8 sps:$4 sm:$0xff]  }
 0x1d4   : > { %v2311_v28 = vld [vmem:[%s3319_s3 + $0x64] ss:$8 sps:$4 sm:$0xff]  }
 0x1d5   : > { %v859_v25 = vadd.f32 %v795_v34, %v595_v63  ;;  %v860_v51 = vadd.f32 %v796_v39, %v596_v9  ;;  %v865_v18 = vadd.f32 %v801_v23, %v601_v3  ;;  %v2310_v23 = vld [vmem:[%s3319_s3 + $0x50] ss:$8 sps:$4 sm:$0xff]   ;;  %v2313_v3 = vld [vmem:[%s3319_s3 + $0x60] ss:$8 sps:$4 sm:$0xff]  }
 0x1d7   : > { %v981_v15 = vpop.permute.xlu1 %980 }
 0x1d8   : > { %v1059_v0 = vmul.f32 %v2731_v45, %v981_v15  ;;  %v1060_v5 = vmul.f32 %v2733_v49, %v981_v15 }
 0x1da   : > { %v1123_v16 = vadd.f32 %v1059_v0, %v859_v25  ;;  %v1124_v59 = vadd.f32 %v1060_v5, %v860_v51  ;;  %v2304_v25 = vld [vmem:[%s3319_s3 + $0x30] ss:$8 sps:$4 sm:$0xff]   ;;  %v2305_v51 = vld [vmem:[%s3319_s3 + $0x44] ss:$8 sps:$4 sm:$0xff]  }
 0x1db   : > { %v985_v24 = vpop.permute.xlu1 %984 }
 0x1dc   : > { %v1061_v55 = vmul.f32 %v2731_v45, %v985_v24  ;;  %v1062_v15 = vmul.f32 %v2733_v49, %v985_v24  ;;  %v1379_v17 = vadd.f32 %v1306_v19, %v1123_v16  ;;  %v1380_v46 = vadd.f32 %v1306_v19, %v1124_v59  ;;  %v2316_v16 = vld [vmem:[%s3319_s3 + $0x70] ss:$8 sps:$4 sm:$0xff]  }
 0x1de   : > { %v1125_v8 = vadd.f32 %v1061_v55, %v861_v58 }
 0x1e0   : > { %v1301_v47 = vpop.permute.xlu1 %1300 }
 0x1e1   : > { %v1377_v60 = vadd.f32 %v1301_v47, %v1121_v7  ;;  %v1378_v6 = vadd.f32 %v1301_v47, %v1122_v11 }
 0x1e3   : > { %v1441_v10 = vmax.f32 %v1377_v60, 0.0  ;;  %v1442_v35 = vmax.f32 %v1378_v6, 0.0  ;;  %v1321_v60 = vpop.permute.xlu0 %1320 }
 0x1e4   : > { %v524_v52 = vpop.permute.xlu1 %523 }
 0x1e5   : > { %v1478_v27 = vpack.c.bf16 %v1442_v35, %v1440_v13  ;;  %v1477_v1 = vpack.c.bf16 %v1441_v10, %v1439_v22  ;;  %v599_v61 = vmul.f32 %v2729_v41, %v524_v52  ;;  %v600_v56 = vmul.f32 %v2736_v53, %v524_v52 }
 0x1e6   : > { %v1444_v35 = vmax.f32 %v1380_v46, 0.0  ;;  %v1443_v41 = vmax.f32 %v1379_v17, 0.0 }
 0x1e7   : > { %1701 = vmatprep.subr.bf16.mxu0 %v1478_v27 }
 0x1e8   : > { %1702 = vmatpush1.bf16.msra.mxu0 %v1477_v1 }
 0x1e9   : > { %v725_v12 = vpop.permute.xlu1 %724 }
 0x1ea   : > { %v799_v43 = vmul.f32 %v2721_v36, %v725_v12  ;;  %v800_v29 = vmul.f32 %v2725_v40, %v725_v12  ;;  %v1126_v40 = vadd.f32 %v1062_v15, %v862_v32  ;;  %v1523_v15 = vpop.permute.xlu0 %1522 }
 0x1ec   : > { %v863_v44 = vadd.f32 %v799_v43, %v599_v61  ;;  %v864_v2 = vadd.f32 %v800_v29, %v600_v56 }
 0x1ee   : > { %v989_v50 = vpop.permute.xlu1 %988 }
 0x1ef   : > { %v1063_v24 = vmul.f32 %v2731_v45, %v989_v50  ;;  %v1064_v37 = vmul.f32 %v2733_v49, %v989_v50  ;;  %v2307_v50 = vld [vmem:[%s3319_s3 + $0x40] ss:$8 sps:$4 sm:$0xff]  }
 0x1f1   : > { %v1127_v6 = vadd.f32 %v1063_v24, %v863_v44  ;;  %v1128_v10 = vadd.f32 %v1064_v37, %v864_v2 }
 0x1f2   : > { %v993_v57 = vpop.permute.xlu1 %992 }
 0x1f3   : > { %v1065_v48 = vmul.f32 %v2731_v45, %v993_v57  ;;  %v1066_v30 = vmul.f32 %v2733_v49, %v993_v57 }
 0x1f5   : > { %v1129_v33 = vadd.f32 %v1065_v48, %v865_v18  ;;  %v1130_v36 = vadd.f32 %v1066_v30, %v866_v4 }
 0x1f7   : > { %v1311_v7 = vpop.permute.xlu1 %1310  ;;  %v1385_v13 = vadd.f32 %v1321_v60, %v1129_v33  ;;  %v1386_v53 = vadd.f32 %v1321_v60, %v1130_v36  ;;  %v1533_v36 = vpop.permute.xlu0 %1532 }
 0x1f8   : > { %v1381_v11 = vadd.f32 %v1311_v7, %v1125_v8  ;;  %v1382_v47 = vadd.f32 %v1311_v7, %v1126_v40 }
 0x1f9   : > { %v1450_v63 = vmax.f32 %v1386_v53, 0.0  ;;  %v1449_v9 = vmax.f32 %v1385_v13, 0.0 }
 0x1fa   : > { %v1445_v22 = vmax.f32 %v1381_v11, 0.0  ;;  %v1446_v45 = vmax.f32 %v1382_v47, 0.0 }
 0x1fb   : > { %v1316_v52 = vpop.permute.xlu1 %1315 }
 0x1fc   : > { %v1383_v49 = vadd.f32 %v1316_v52, %v1127_v6  ;;  %v1384_v27 = vadd.f32 %v1316_v52, %v1128_v10  ;;  %v1480_v1 = vpack.c.bf16 %v1446_v45, %v1444_v35  ;;  %v1479_v12 = vpack.c.bf16 %v1445_v22, %v1443_v41  ;;  %v1543_v45 = vpop.permute.xlu0 %1542 }
 0x1fe   : > { %v1447_v34 = vmax.f32 %v1383_v49, 0.0  ;;  %v1448_v39 = vmax.f32 %v1384_v27, 0.0  ;;  %1703 = vmatprep.subr.bf16.mxu0 %v1480_v1 }
 0x1ff   : > { %1704 = vmatpush1.bf16.msra.mxu0 %v1479_v12  ;;  %v1518_v59 = vpop.permute.xlu1 %1517 }
 0x200   : > { %v1482_v0 = vpack.c.bf16 %v1450_v63, %v1448_v39  ;;  %v1481_v5 = vpack.c.bf16 %v1449_v9, %v1447_v34 }
 0x202   : > { %1705 = vmatprep.subr.bf16.mxu0 %v1482_v0 }
 0x203   : > { %1706 = vmatpush1.bf16.msra.mxu0 %v1481_v5  ;;  %v1528_v61 = vpop.permute.xlu1 %1527 }
 0x206   : > { %1708 = vmatmul.mubr.bf16.vlgmr.msra.gmra.mrb[0].mxu0 %v2293_v38 }
 0x207   : > { %1717 = vmatprep.mubr.bf16.mxu0 %v2296_v26  ;;  %v1538_v35 = vpop.permute.xlu1 %1537 }
 0x20b   : > { %v1548_v5 = vpop.permute.xlu1 %1547 }
 0x20e   : > { %1718 = vmatmul.mubr.bf16.gmra.mrb[4].mxu0 %v2298_v21 }
 0x20f   : > { %1727 = vmatprep.mubr.bf16.mxu0 %v2299_v20 }
 0x216   : > { %1728 = vmatmul.mubr.bf16.gmra.mrb[8].mxu0 %v2301_v14  ;;  %v1553_v14 = vpop.permute.xlu0 %1552 }
 0x217   : > { %1737 = vmatprep.mubr.bf16.mxu0 %v2302_v62 }
 0x21e   : > { %1738 = vmatmul.mubr.bf16.gmra.mrb[12].mxu0 %v2304_v25 }
 0x21f   : > { %1747 = vmatprep.mubr.bf16.mxu0 %v2305_v51 }
 0x226   : > { %1748 = vmatmul.mubr.bf16.gmra.mrb[16].mxu0 %v2307_v50 }
 0x227   : > { %1757 = vmatprep.mubr.bf16.mxu0 %v2308_v42 }
 0x22e   : > { %1758 = vmatmul.mubr.bf16.gmra.mrb[20].mxu0 %v2310_v23 }
 0x22f   : > { %1767 = vmatprep.mubr.bf16.mxu0 %v2311_v28 }
 0x236   : > { %1768 = vmatmul.mubr.bf16.gmra.mrb[24].mxu0 %v2313_v3 }
 0x237   : > { %1777 = vmatprep.mubr.bf16.mxu0 %v2314_v54 }
 0x23e   : > { %1778 = vmatmul.mubr.bf16.gmra.mrb[28].mxu0 %v2316_v16 }
 0x2d9   : > { %v1709_v58 = vpop.f32.mrb[0].mxu0 }
 0x2da   : > { %v1710_v32 = vadd.f32 %v1709_v58, %v1518_v59  ;;  %v1711_v55 = vpop.f32.mrb[1].mxu0 }
 0x2db   : > { %v1712_v57 = vadd.f32 %v1711_v55, %v1518_v59  ;;  %v1713_v19 = vpop.f32.mrb[2].mxu0  ;;  %v1558_v59 = vpop.permute.xlu1 %1557 }
 0x2dc   : > { %v1714_v43 = vadd.f32 %v1713_v19, %v1523_v15  ;;  %v1715_v29 = vpop.f32.mrb[3].mxu0  ;;  %v1788_v30 = vmax.f32 %v1710_v32, 0.0 }
 0x2dd   : > { %v1716_v48 = vadd.f32 %v1715_v29, %v1523_v15  ;;  %v1789_v4 = vmax.f32 %v1712_v57, 0.0  ;;  %v1563_v57 = vpop.permute.xlu0 %1562 }
 0x2de   : > { %v1790_v18 = vmax.f32 %v1714_v43, 0.0 }
 0x2df   : > { %v1791_v17 = vmax.f32 %v1716_v48, 0.0 }
 0x2e0   : > { %v1820_v46 = vpack.c.bf16 %v1790_v18, %v1788_v30 }
 0x2e1   : > { %v1719_v56 = vpop.f32.mrb[4].mxu0  ;;  %v1821_v24 = vpack.c.bf16 %v1791_v17, %v1789_v4 }
 0x2e2   : > { %v1720_v37 = vadd.f32 %v1719_v56, %v1528_v61  ;;  %v1721_v33 = vpop.f32.mrb[5].mxu0  ;;  %v1568_v56 = vpop.permute.xlu1 %1567 }
 0x2e3   : > { %v1722_v8 = vadd.f32 %v1721_v33, %v1528_v61  ;;  %v1723_v40 = vpop.f32.mrb[6].mxu0  ;;  %1916 = vmatprep.subr.bf16.mxu1 %v1821_v24 }
 0x2e4   : > { %v1724_v44 = vadd.f32 %v1723_v40, %v1533_v36  ;;  %v1725_v2 = vpop.f32.mrb[7].mxu0  ;;  %1917 = vmatpush1.bf16.msra.mxu1 %v1820_v46  ;;  %v1792_v11 = vmax.f32 %v1720_v37, 0.0 }
 0x2e5   : > { %v1726_v7 = vadd.f32 %v1725_v2, %v1533_v36  ;;  %v1793_v60 = vmax.f32 %v1722_v8, 0.0  ;;  %v1573_v8 = vpop.permute.xlu0 %1572 }
 0x2e6   : > { %v1794_v47 = vmax.f32 %v1724_v44, 0.0 }
 0x2e7   : > { %v1795_v6 = vmax.f32 %v1726_v7, 0.0 }
 0x2e8   : > { %v1822_v10 = vpack.c.bf16 %v1794_v47, %v1792_v11 }
 0x2e9   : > { %v1823_v41 = vpack.c.bf16 %v1795_v6, %v1793_v60  ;;  %v1729_v13 = vpop.f32.mrb[8].mxu0 }
 0x2ea   : > { %v1730_v53 = vadd.f32 %v1729_v13, %v1538_v35  ;;  %v1731_v22 = vpop.f32.mrb[9].mxu0 }
 0x2eb   : > { %v1732_v52 = vadd.f32 %v1731_v22, %v1538_v35  ;;  %v1733_v49 = vpop.f32.mrb[10].mxu0  ;;  %1918 = vmatprep.subr.bf16.mxu1 %v1823_v41  ;;  %v1578_v41 = vpop.permute.xlu1 %1577 }
 0x2ec   : > { %v1734_v27 = vadd.f32 %v1733_v49, %v1543_v45  ;;  %v1735_v1 = vpop.f32.mrb[11].mxu0  ;;  %1919 = vmatpush1.bf16.msra.mxu1 %v1822_v10  ;;  %v1796_v34 = vmax.f32 %v1730_v53, 0.0 }
 0x2ed   : > { %v1736_v12 = vadd.f32 %v1735_v1, %v1543_v45  ;;  %v1797_v63 = vmax.f32 %v1732_v52, 0.0  ;;  %v1583_v52 = vpop.permute.xlu0 %1582 }
 0x2ee   : > { %v1798_v39 = vmax.f32 %v1734_v27, 0.0 }
 0x2ef   : > { %v1799_v9 = vmax.f32 %v1736_v12, 0.0 }
 0x2f0   : > { %v1824_v0 = vpack.c.bf16 %v1798_v39, %v1796_v34 }
 0x2f1   : > { %v1825_v38 = vpack.c.bf16 %v1799_v9, %v1797_v63  ;;  %v1739_v26 = vpop.f32.mrb[12].mxu0 }
 0x2f2   : > { %v1740_v21 = vadd.f32 %v1739_v26, %v1548_v5  ;;  %v1741_v20 = vpop.f32.mrb[13].mxu0 }
 0x2f3   : > { %v1742_v62 = vadd.f32 %v1741_v20, %v1548_v5  ;;  %v1743_v25 = vpop.f32.mrb[14].mxu0  ;;  %1920 = vmatprep.subr.bf16.mxu1 %v1825_v38  ;;  %v1588_v38 = vpop.permute.xlu1 %1587 }
 0x2f4   : > { %v1744_v51 = vadd.f32 %v1743_v25, %v1553_v14  ;;  %v1745_v50 = vpop.f32.mrb[15].mxu0  ;;  %1921 = vmatpush1.bf16.msra.mxu1 %v1824_v0  ;;  %v1800_v23 = vmax.f32 %v1740_v21, 0.0 }
 0x2f5   : > { %v1746_v42 = vadd.f32 %v1745_v50, %v1553_v14  ;;  %v1801_v3 = vmax.f32 %v1742_v62, 0.0  ;;  %v1593_v62 = vpop.permute.xlu0 %1592 }
 0x2f6   : > { %v1802_v28 = vmax.f32 %v1744_v51, 0.0 }
 0x2f7   : > { %v1803_v54 = vmax.f32 %v1746_v42, 0.0 }
 0x2f8   : > { %v1826_v16 = vpack.c.bf16 %v1802_v28, %v1800_v23 }
 0x2f9   : > { %v1827_v58 = vpack.c.bf16 %v1803_v54, %v1801_v3  ;;  %v1749_v32 = vpop.f32.mrb[16].mxu0 }
 0x2fa   : > { %v1750_v55 = vadd.f32 %v1749_v32, %v1558_v59  ;;  %v1751_v15 = vpop.f32.mrb[17].mxu0  ;;  %v2317_v32 = vld [vmem:[%s3321_s5] sm:$0xff]  }
 0x2fb   : > { %v1752_v19 = vadd.f32 %v1751_v15, %v1558_v59  ;;  %v1753_v43 = vpop.f32.mrb[18].mxu0  ;;  %1922 = vmatprep.subr.bf16.mxu1 %v1827_v58  ;;  %v2319_v15 = vld [vmem:[%s3321_s5 + $0x10] sm:$0xff]  }
 0x2fc   : > { %v1754_v29 = vadd.f32 %v1753_v43, %v1563_v57  ;;  %v1755_v48 = vpop.f32.mrb[19].mxu0  ;;  %1923 = vmatpush1.bf16.msra.mxu1 %v1826_v16  ;;  %v1804_v18 = vmax.f32 %v1750_v55, 0.0  ;;  %v2318_v55 = vld [vmem:[%s3321_s5 + $0x8] sm:$0xff]   ;;  %v1855_v43 = vpop.permute.xlu1 %1854 }
 0x2fd   : > { %v1756_v30 = vadd.f32 %v1755_v48, %v1563_v57  ;;  %v1805_v17 = vmax.f32 %v1752_v19, 0.0  ;;  %v2320_v57 = vld [vmem:[%s3321_s5 + $0x18] sm:$0xff]   ;;  %v1860_v19 = vpop.permute.xlu0 %1859 }
 0x2fe   : > { %v1806_v4 = vmax.f32 %v1754_v29, 0.0 }
 0x2ff   : > { %v1807_v46 = vmax.f32 %v1756_v30, 0.0 }
 0x300   : > { %v1828_v61 = vpack.c.bf16 %v1806_v4, %v1804_v18  ;;  %v1865_v48 = vpop.permute.xlu1 %1864 }
 0x301   : > { %v1829_v24 = vpack.c.bf16 %v1807_v46, %v1805_v17  ;;  %v1759_v37 = vpop.f32.mrb[20].mxu0  ;;  %v1870_v29 = vpop.permute.xlu0 %1869 }
 0x302   : > { %v1760_v33 = vadd.f32 %v1759_v37, %v1568_v56  ;;  %v1761_v36 = vpop.f32.mrb[21].mxu0 }
 0x303   : > { %v1762_v40 = vadd.f32 %v1761_v36, %v1568_v56  ;;  %v1763_v44 = vpop.f32.mrb[22].mxu0  ;;  %1924 = vmatprep.subr.bf16.mxu1 %v1829_v24 }
 0x304   : > { %v1764_v2 = vadd.f32 %v1763_v44, %v1573_v8  ;;  %v1765_v7 = vpop.f32.mrb[23].mxu0  ;;  %1925 = vmatpush1.bf16.msra.mxu1 %v1828_v61  ;;  %v1808_v47 = vmax.f32 %v1760_v33, 0.0  ;;  %v2016_v18 = vpop.permute.xlu1 %2015 }
 0x305   : > { %v1766_v11 = vadd.f32 %v1765_v7, %v1573_v8  ;;  %v1809_v6 = vmax.f32 %v1762_v40, 0.0  ;;  %v2021_v30 = vpop.permute.xlu0 %2020 }
 0x306   : > { %v1810_v60 = vmax.f32 %v1764_v2, 0.0 }
 0x307   : > { %v1811_v10 = vmax.f32 %v1766_v11, 0.0 }
 0x308   : > { %v1830_v35 = vpack.c.bf16 %v1810_v60, %v1808_v47  ;;  %v1875_v36 = vpop.permute.xlu1 %1874 }
 0x309   : > { %v1831_v13 = vpack.c.bf16 %v1811_v10, %v1809_v6  ;;  %v1769_v53 = vpop.f32.mrb[24].mxu0  ;;  %v2026_v24 = vpop.permute.xlu0 %2025 }
 0x30a   : > { %v1770_v22 = vadd.f32 %v1769_v53, %v1578_v41  ;;  %v1771_v45 = vpop.f32.mrb[25].mxu0 }
 0x30b   : > { %v1772_v49 = vadd.f32 %v1771_v45, %v1578_v41  ;;  %v1773_v27 = vpop.f32.mrb[26].mxu0  ;;  %1926 = vmatprep.subr.bf16.mxu1 %v1831_v13 }
 0x30c   : > { %v1774_v1 = vadd.f32 %v1773_v27, %v1583_v52  ;;  %v1775_v12 = vpop.f32.mrb[27].mxu0  ;;  %1927 = vmatpush1.bf16.msra.mxu1 %v1830_v35  ;;  %v1812_v39 = vmax.f32 %v1770_v22, 0.0  ;;  %v1880_v53 = vpop.permute.xlu1 %1879 }
 0x30d   : > { %v1776_v34 = vadd.f32 %v1775_v12, %v1583_v52  ;;  %v1813_v9 = vmax.f32 %v1772_v49, 0.0  ;;  %v2031_v10 = vpop.permute.xlu0 %2030 }
 0x30e   : > { %v1814_v63 = vmax.f32 %v1774_v1, 0.0 }
 0x30f   : > { %v1815_v0 = vmax.f32 %v1776_v34, 0.0 }
 0x310   : > { %v1832_v5 = vpack.c.bf16 %v1814_v63, %v1812_v39 }
 0x311   : > { %v1833_v26 = vpack.c.bf16 %v1815_v0, %v1813_v9  ;;  %v1779_v21 = vpop.f32.mrb[28].mxu0 }
 0x312   : > { %v1780_v20 = vadd.f32 %v1779_v21, %v1588_v38  ;;  %v1781_v14 = vpop.f32.mrb[29].mxu0  ;;  %v1885_v21 = vpop.permute.xlu1 %1884 }
 0x313   : > { %v1782_v25 = vadd.f32 %v1781_v14, %v1588_v38  ;;  %v1783_v51 = vpop.f32.mrb[30].mxu0  ;;  %1928 = vmatprep.subr.bf16.mxu1 %v1833_v26 }
 0x314   : > { %v1784_v50 = vadd.f32 %v1783_v51, %v1593_v62  ;;  %v1785_v42 = vpop.f32.mrb[31].mxu0  ;;  %1929 = vmatpush1.bf16.msra.mxu1 %v1832_v5  ;;  %v1816_v28 = vmax.f32 %v1780_v20, 0.0  ;;  %v2036_v5 = vpop.permute.xlu0 %2035 }
 0x315   : > { %v1786_v23 = vadd.f32 %v1785_v42, %v1593_v62  ;;  %v1817_v54 = vmax.f32 %v1782_v25, 0.0 }
 0x316   : > { %v1818_v3 = vmax.f32 %v1784_v50, 0.0 }
 0x317   : > { %v1819_v16 = vmax.f32 %v1786_v23, 0.0 }
 0x318   : > { %v1834_v59 = vpack.c.bf16 %v1818_v3, %v1816_v28 }
 0x319   : > { %v1835_v58 = vpack.c.bf16 %v1819_v16, %v1817_v54 }
 0x31b   : > { %1930 = vmatprep.subr.bf16.mxu1 %v1835_v58 }
 0x31c   : > { %1931 = vmatpush1.bf16.msra.mxu1 %v1834_v59 }
 0x31f   : > { %1949 = vmatmul.mubr.bf16.vlgmr.msra.gmra.mrb[0].mxu1 %v2317_v32 }
 0x320   : > { %1958 = vmatprep.mubr.bf16.mxu1 %v3357_v31 }
 0x327   : > { %1959 = vmatmul.mubr.bf16.gmra.mrb[4].mxu1 %v2318_v55 }
 0x328   : > { %1968 = vmatprep.mubr.bf16.mxu1 %v3357_v31 }
 0x32f   : > { %1969 = vmatmul.mubr.bf16.gmra.mrb[8].mxu1 %v2319_v15  ;;  %v2041_v15 = vpop.permute.xlu0 %2040 }
 0x330   : > { %1978 = vmatprep.mubr.bf16.mxu1 %v3357_v31 }
 0x337   : > { %1979 = vmatmul.mubr.bf16.gmra.mrb[12].mxu1 %v2320_v57  ;;  %v1890_v57 = vpop.permute.xlu1 %1889 }
 0x3f2   : > { %v1950_v4 = vpop.f32.mrb[0].mxu1 }
 0x3f3   : > { %v1951_v17 = vadd.f32 %v1950_v4, %v1855_v43  ;;  %v1952_v46 = vpop.f32.mrb[1].mxu1 }
 0x3f4   : > { %v1953_v61 = vadd.f32 %v1952_v46, %v1855_v43  ;;  %v1954_v56 = vpop.f32.mrb[2].mxu1 }
 0x3f5   : > { %v1989_v37 = vmax.f32 %v1951_v17, 0.0  ;;  %v1955_v33 = vadd.f32 %v1954_v56, %v1860_v19  ;;  %v1956_v31 = vpop.f32.mrb[3].mxu1 }
 0x3f6   : > { %v1990_v8 = vmax.f32 %v1953_v61, 0.0  ;;  %v1957_v40 = vadd.f32 %v1956_v31, %v1860_v19 }
 0x3f7   : > { %v1991_v44 = vmax.f32 %v1955_v33, 0.0  ;;  %v2053_v7 = vmul.f32 %v2016_v18, %v1989_v37 }
 0x3f8   : > { %v1992_v2 = vmax.f32 %v1957_v40, 0.0  ;;  %v2054_v47 = vmul.f32 %v2016_v18, %v1990_v8  ;;  %v2046_v8 = vpop.permute.xlu1 %2045 }
 0x3f9   : > { %v2055_v11 = vmul.f32 %v2021_v30, %v1991_v44 }
 0x3fa   : > { %v2056_v60 = vmul.f32 %v2021_v30, %v1992_v2  ;;  %v1960_v6 = vpop.f32.mrb[4].mxu1 }
 0x3fb   : > { %v2069_v35 = vadd.f32 %v2055_v11, %v2053_v7  ;;  %v1961_v41 = vadd.f32 %v1960_v6, %v1865_v48  ;;  %v1962_v13 = vpop.f32.mrb[5].mxu1  ;;  %v2051_v11 = vpop.permute.xlu0 %2050 }
 0x3fc   : > { %v2082_v22 = vadd.f32 %v2056_v60, %v2054_v47  ;;  %v1963_v45 = vadd.f32 %v1962_v13, %v1865_v48  ;;  %v1964_v52 = vpop.f32.mrb[6].mxu1 }
 0x3fd   : > { %v1993_v49 = vmax.f32 %v1961_v41, 0.0  ;;  %v1965_v27 = vadd.f32 %v1964_v52, %v1870_v29  ;;  %v1966_v1 = vpop.f32.mrb[7].mxu1 }
 0x3fe   : > { %v1994_v12 = vmax.f32 %v1963_v45, 0.0  ;;  %v1967_v34 = vadd.f32 %v1966_v1, %v1870_v29 }
 0x3ff   : > { %v2057_v39 = vmul.f32 %v2026_v24, %v1993_v49  ;;  %v1995_v63 = vmax.f32 %v1965_v27, 0.0 }
 0x400   : > { %v2058_v9 = vmul.f32 %v2026_v24, %v1994_v12  ;;  %v1996_v0 = vmax.f32 %v1967_v34, 0.0  ;;  %v2099_v34 = vpop.permute.xlu1 %2098 }
 0x401   : > { %v2070_v38 = vadd.f32 %v2069_v35, %v2057_v39  ;;  %v2059_v26 = vmul.f32 %v2031_v10, %v1995_v63 }
 0x402   : > { %v2083_v20 = vadd.f32 %v2082_v22, %v2058_v9  ;;  %v2060_v14 = vmul.f32 %v2031_v10, %v1996_v0  ;;  %v1970_v62 = vpop.f32.mrb[8].mxu1  ;;  %v3367_v0 = vld [vmem:[#allocation12_spill] sm:$0xff] }
 0x403   : > { %v2071_v25 = vadd.f32 %v2070_v38, %v2059_v26  ;;  %v1971_v51 = vadd.f32 %v1970_v62, %v1875_v36  ;;  %v1972_v50 = vpop.f32.mrb[9].mxu1 }
 0x404   : > { %v2084_v42 = vadd.f32 %v2083_v20, %v2060_v14  ;;  %v1973_v23 = vadd.f32 %v1972_v50, %v1875_v36  ;;  %v1974_v28 = vpop.f32.mrb[10].mxu1 }
 0x405   : > { %v1997_v3 = vmax.f32 %v1971_v51, 0.0  ;;  %v1975_v54 = vadd.f32 %v1974_v28, %v1880_v53  ;;  %v1976_v16 = vpop.f32.mrb[11].mxu1 }
 0x406   : > { %v1998_v59 = vmax.f32 %v1973_v23, 0.0  ;;  %v1977_v58 = vadd.f32 %v1976_v16, %v1880_v53  ;;  %v2342_v16 = vmov 1966171168  }
 0x407   : > { %v2061_v32 = vmul.f32 %v2036_v5, %v1997_v3  ;;  %v1999_v55 = vmax.f32 %v1975_v54, 0.0 }
 0x408   : > { %v2062_v19 = vmul.f32 %v2036_v5, %v1998_v59  ;;  %v2000_v43 = vmax.f32 %v1977_v58, 0.0  ;;  %v2104_v5 = vrot.slane %v2099_v34, %v3367_v0  ;;  %v2131_v59 = vunpack.c.l.s4 %v2342_v16 }
 0x409   : > { %v2072_v29 = vadd.f32 %v2071_v25, %v2061_v32  ;;  %v2063_v48 = vmul.f32 %v2041_v15, %v1999_v55 }
 0x40a   : > { %v2085_v30 = vadd.f32 %v2084_v42, %v2062_v19  ;;  %v2064_v18 = vmul.f32 %v2041_v15, %v2000_v43  ;;  %v1980_v4 = vpop.f32.mrb[12].mxu1  ;;  %v2132_v58 = vunpack.c.0.s8 %v2131_v59  ;;  %v3368_v43 = vld [vmem:[#allocation9_spill] sm:$0xff] }
 0x40b   : > { %v2073_v17 = vadd.f32 %v2072_v29, %v2063_v48  ;;  %v1981_v46 = vadd.f32 %v1980_v4, %v1885_v21  ;;  %v1982_v61 = vpop.f32.mrb[13].mxu1  ;;  %v3369_v4 = vlaneseq }
 0x40c   : > { %v2086_v56 = vadd.f32 %v2085_v30, %v2064_v18  ;;  %v1983_v24 = vadd.f32 %v1982_v61, %v1885_v21  ;;  %v1984_v37 = vpop.f32.mrb[14].mxu1  ;;  %v2135_v29 = vsub.s32 %v2132_v58, %v3368_v43 }
 0x40d   : > { %v2001_v33 = vmax.f32 %v1981_v46, 0.0  ;;  %v1985_v31 = vadd.f32 %v1984_v37, %v1890_v57  ;;  %v1986_v36 = vpop.f32.mrb[15].mxu1  ;;  %vm2147_vm2 = vcmp.lt.s32.totalorder %v3369_v4, 256 }
 0x40e   : > { %v2002_v40 = vmax.f32 %v1983_v24, 0.0  ;;  %v1987_v44 = vadd.f32 %v1986_v36, %v1890_v57 }
 0x40f   : > { %v2065_v2 = vmul.f32 %v2046_v8, %v2001_v33  ;;  %v2003_v7 = vmax.f32 %v1985_v31, 0.0 }
 0x410   : > { %v2066_v47 = vmul.f32 %v2046_v8, %v2002_v40  ;;  %v2004_v60 = vmax.f32 %v1987_v44, 0.0 }
 0x411   : > { %v2074_v6 = vadd.f32 %v2073_v17, %v2065_v2  ;;  %v2067_v10 = vmul.f32 %v2051_v11, %v2003_v7 }
 0x412   : > { %v2087_v35 = vadd.f32 %v2086_v56, %v2066_v47  ;;  %v2068_v41 = vmul.f32 %v2051_v11, %v2004_v60 }
 0x413   : > { %v2075_v13 = vadd.f32 %v2074_v6, %v2067_v10 }
 0x414   : > { %v2088_v53 = vadd.f32 %v2087_v35, %v2068_v41 }
 0x415   : > { %v2076_v22 = vrot.slane %v2075_v13, 4 }
 0x416   : > { %v2089_v45 = vrot.slane %v2088_v53, 4 }
 0x417   : > { %v2077_v52 = vadd.f32 %v2076_v22, %v2075_v13 }
 0x418   : > { %v2090_v49 = vadd.f32 %v2089_v45, %v2088_v53 }
 0x419   : > { %v2078_v27 = vrot.slane %v2077_v52, 2 }
 0x41a   : > { %v2091_v1 = vrot.slane %v2090_v49, 2 }
 0x41b   : > { %v2079_v12 = vadd.f32 %v2078_v27, %v2077_v52 }
 0x41c   : > { %v2092_v39 = vadd.f32 %v2091_v1, %v2090_v49 }
 0x41d   : > { %v2080_v63 = vrot.slane %v2079_v12, 1 }
 0x41e   : > { %v2093_v9 = vrot.slane %v2092_v39, 1 }
 0x41f   : > { %v2081_v38 = vadd.f32 %v2080_v63, %v2079_v12 }
 0x420   : > { %v2094_v26 = vadd.f32 %v2093_v9, %v2092_v39 }
 0x421   : > { %v2105_v21 = vadd.f32 %v2104_v5, %v2081_v38 }
 0x422   : > { %v2106_v20 = vadd.f32 %v2104_v5, %v2094_v26 }
 0x423   : > { %v2107_v14 = vand.u32 2147483647, %v2105_v21  ;;  %vm2121_vm0 = vcmp.ge.f32.partialorder %v2105_v21, 0.0 }
 0x424   : > { %v2108_v62 = vand.u32 2147483647, %v2106_v20  ;;  %vm2122_vm1 = vcmp.ge.f32.partialorder %v2106_v20, 0.0 }
 0x425   : > { %v2109_v25 = vsub.f32 0.0, %v2107_v14 }
 0x426   : > { %v2110_v51 = vsub.f32 0.0, %v2108_v62 }
 0x427   : > { %v2111_v50 = vmul.f32 1.442695, %v2109_v25 }
 0x428   : > { %v2113_v42 = vmul.f32 1.442695, %v2110_v51 }
 0x429   : > { %2321 = vpow2.f32 %v2111_v50 }
 0x42a   : > { %2323 = vpow2.f32 %v2113_v42 }
 0x433   : > { %v2322_v23 = vpop.eup %2321 }
 0x434   : > { %v2324_v28 = vpop.eup %2323  ;;  %v2115_v3 = vadd.f32 1.0, %v2322_v23 }
 0x435   : > { %v2116_v54 = vadd.f32 1.0, %v2324_v28 }
 0x436   : > { %2325 = vrcp.f32 %v2115_v3 }
 0x437   : > { %2327 = vrcp.f32 %v2116_v54 }
 0x440   : > { %v2326_v32 = vpop.eup %2325 }
 0x441   : > { %v2328_v55 = vpop.eup %2327  ;;  %v2123_v15 = vmul.f32 %v2326_v32, %v2322_v23 }
 0x442   : > { %v2124_v57 = vmul.f32 %v2328_v55, %v2324_v28 }
 0x443   : > { %v2125_v19 = vsel %vm2121_vm0, %v2326_v32, %v2123_v15 }
 0x444   : > { %v2126_v48 = vsel %vm2122_vm1, %v2328_v55, %v2124_v57 }
 0x445   : > { %v2129_v30 = vcombine.low %v2125_v19, %v2126_v48 }
 0x447   : > { %v2136_v18 = vrot.slane %v2129_v30, %v2135_v29 }
 0x449   : > { %v2143_v17 = vrot.slane %v2136_v18, %v2135_v29 }
 0x44b   : > { %2149 = vst.msk [vmem:[%s334_s8] sm:$0x3] %vm2147_vm2, %v2143_v17 }
 0x44c PF: > { %s21_s11 = sadd.s32 1, %s2337_s11  }
 0x44d   : > { %p18_p4 = scmp.ge.s32.totalorder %s21_s11, 4  }
 0x44f   :  { %20 = sbr.rel (!%p18_p4) target bundleno = 3 (0x3), region = 86 }

</bundles_post_ra>
